<compile_context>
chip_gen: v7x
topology: tpu7x:2x2x1
jax: 0.10.0
libtpu: 0.0.40
codegen_flags: <defaults>
</compile_context>

<pallas_src>
import math

import jax
import jax.numpy as jnp
from jax import lax
from jax.experimental import pallas as pl
from jax.experimental.pallas import tpu as pltpu


def _bidaf_kernel(c_ref, qbf_ref, qcq_ref, s1q_ref, s0c_ref,
                  oc_ref, oa_ref, oca_ref, ocb_ref):
    """One batch element per grid step.

    c_ref   : (1, Lc_p, H_p)  f32   context
    qbf_ref : (1, Lq_p, H_p)  bf16  query (MXU operand only)
    qcq_ref : (1, Lq_p, H_p)  bf16  query * cq_weight (MXU operand only)
    s1q_ref : (1, 1, Lq_p)    f32   q.q_weight + additive query mask (0 / -1e30)
    s0c_ref : (1, 1, Lc_p)    f32   c.c_weight + additive context mask (0 / -1e30)
    oc_ref  : (1, Lc_p, H_p)  f32   c
    oa_ref  : (1, Lc_p, H_p)  f32   a        (c2q attention)
    oca_ref : (1, Lc_p, H_p)  f32   c * a
    ocb_ref : (1, Lc_p, H_p)  f32   c * b    (q2c attention)
    """
    c = c_ref[0]              # (Lc, H)   f32
    q_bf = qbf_ref[0]         # (Lq, H)   bf16
    qcq_bf = qcq_ref[0]       # (Lq, H)   bf16
    s1_row = s1q_ref[0]       # (1, Lq)   f32  (mask folded in)
    s0_row = s0c_ref[0]       # (1, Lc)   f32  (mask folded in)

    c_bf = c.astype(jnp.bfloat16)

    # s2[i, j] = sum_h c[i,h] * (cq_weight[h] * q[j,h]) — no materialized q.T
    s2 = lax.dot_general(c_bf, qcq_bf, (((1,), (1,)), ((), ())),
                         preferred_element_type=jnp.float32)          # (Lc, Lq)
    # s2^T computed directly on the MXU (instead of an XLU transpose of s2).
    s2t = lax.dot_general(qcq_bf, c_bf, (((1,), (1,)), ((), ())),
                          preferred_element_type=jnp.float32)         # (Lq, Lc)

    # ---- context-to-query softmax (over query / lane axis); s0 + bias are
    # constant along this axis and cancel exactly; mask is additive.
    logits_q = s2 + s1_row                                            # (Lc, Lq)
    m1 = jnp.max(logits_q, axis=-1, keepdims=True)
    e1 = jnp.exp(logits_q - m1)
    sm1 = e1 * pl.reciprocal(jnp.sum(e1, axis=-1, keepdims=True), approx=True)

    # ---- query-to-context softmax, in transposed layout so the reduction is
    # also a lane-axis reduction; s1 + bias cancel; mask is additive.
    logits_c = s2t + s0_row                                           # (Lq, Lc)
    m2 = jnp.max(logits_c, axis=-1, keepdims=True)
    e2 = jnp.exp(logits_c - m2)
    sm2t = e2 * pl.reciprocal(jnp.sum(e2, axis=-1, keepdims=True), approx=True)

    # ---- attention outputs (bf16 MXU operands, f32 accumulate) ----
    sm1_bf = sm1.astype(jnp.bfloat16)
    a = jnp.dot(sm1_bf, q_bf, preferred_element_type=jnp.float32)     # (Lc, H)
    # Reassociated: b = sm1 @ (sm2^T @ c) — exact, avoids the (Lc, Lc) block.
    qc = jnp.dot(sm2t.astype(jnp.bfloat16), c_bf,
                 preferred_element_type=jnp.float32)                  # (Lq, H)
    b = jnp.dot(sm1_bf, qc.astype(jnp.bfloat16),
                preferred_element_type=jnp.float32)                   # (Lc, H)

    # Lane-dense full-slab stores (H_p is a multiple of 128).
    oc_ref[0] = c
    oa_ref[0] = a
    oca_ref[0] = c * a
    ocb_ref[0] = c * b


def _round_up(x, m):
    return (x + m - 1) // m * m


def bidaf_attention(c, q, c_mask, q_mask, c_weight, q_weight, cq_weight, bias):
    """BiDAF attention forward (eval mode).

    c: (B, Lc, H), q: (B, Lq, H); masks: (B, Lc) / (B, Lq) bool or {0,1}.
    Returns (B, Lc, 4H) float32. `bias` is accepted for API parity but is a
    constant shift along both softmax axes, so it cancels exactly.
    """
    B, Lc, H = c.shape
    Lq = q.shape[1]

    c = c.astype(jnp.float32)
    q = q.astype(jnp.float32)
    cw = c_weight.astype(jnp.float32).reshape(1, 1, H)
    qw = q_weight.astype(jnp.float32).reshape(1, 1, H)
    cqw = cq_weight.astype(jnp.float32).reshape(1, 1, H)
    del bias  # cancels (softmax shift invariance)

    neg = jnp.float32(-1e30)
    cm = c_mask.astype(jnp.float32) > 0
    qm = q_mask.astype(jnp.float32) > 0

    # Rank-1 score terms + additive masks, precomputed as lane-major rows.
    s1q = jnp.sum(q * qw, axis=-1) + jnp.where(qm, 0.0, neg)          # (B, Lq)
    s0c = jnp.sum(c * cw, axis=-1) + jnp.where(cm, 0.0, neg)          # (B, Lc)

    # Fold cq_weight into q (much smaller than c); bf16 since it is MXU-only.
    q_cq = q * cqw                                                    # (B, Lq, H)

    # Lane/sublane-friendly padding (all padding masked / zero / sliced off).
    Hp = _round_up(H, 128)
    Lq_p = _round_up(Lq, 128)
    Lc_p = _round_up(Lc, 128)

    c_p = jnp.pad(c, ((0, 0), (0, Lc_p - Lc), (0, Hp - H)))
    q_bf = jnp.pad(q, ((0, 0), (0, Lq_p - Lq), (0, Hp - H))).astype(jnp.bfloat16)
    qcq_bf = jnp.pad(q_cq, ((0, 0), (0, Lq_p - Lq), (0, Hp - H))).astype(jnp.bfloat16)
    s1q_p = jnp.pad(s1q, ((0, 0), (0, Lq_p - Lq)),
                    constant_values=-1e30).reshape(B, 1, Lq_p)
    s0c_p = jnp.pad(s0c, ((0, 0), (0, Lc_p - Lc)),
                    constant_values=-1e30).reshape(B, 1, Lc_p)

    # Rough per-grid-step VMEM footprint (double-buffered I/O + temporaries).
    f32b, bf16b = 4, 2
    per_step = (
        2 * (f32b * Lc_p * Hp + 2 * bf16b * Lq_p * Hp + f32b * (Lq_p + Lc_p))
        + 2 * 4 * f32b * Lc_p * Hp
        + 8 * f32b * Lc_p * Lq_p
        + 6 * f32b * Lc_p * Hp + 2 * f32b * Lq_p * Hp
    )
    try:
        vmem_cap = int(getattr(pltpu.get_tpu_info(), "vmem_capacity_bytes",
                               64 * 2**20))
    except Exception:
        vmem_cap = 64 * 2**20
    vmem_limit = int(min(max(2 * per_step, 32 * 2**20), int(0.75 * vmem_cap)))

    slab = jax.ShapeDtypeStruct((B, Lc_p, Hp), jnp.float32)
    slab_spec = pl.BlockSpec((1, Lc_p, Hp), lambda i: (i, 0, 0))

    oc, oa, oca, ocb = pl.pallas_call(
        _bidaf_kernel,
        out_shape=(slab, slab, slab, slab),
        grid_spec=pltpu.PrefetchScalarGridSpec(
            num_scalar_prefetch=0,
            grid=(B,),
            in_specs=[
                pl.BlockSpec((1, Lc_p, Hp), lambda i: (i, 0, 0)),   # c (f32)
                pl.BlockSpec((1, Lq_p, Hp), lambda i: (i, 0, 0)),   # q (bf16)
                pl.BlockSpec((1, Lq_p, Hp), lambda i: (i, 0, 0)),   # q*cqw (bf16)
                pl.BlockSpec((1, 1, Lq_p), lambda i: (i, 0, 0)),    # s1 + qmask row
                pl.BlockSpec((1, 1, Lc_p), lambda i: (i, 0, 0)),    # s0 + cmask row
            ],
            out_specs=[slab_spec, slab_spec, slab_spec, slab_spec],
        ),
        compiler_params=pltpu.CompilerParams(
            dimension_semantics=("parallel",),
            vmem_limit_bytes=vmem_limit),
    )(c_p, q_bf, qcq_bf, s1q_p, s0c_p)

    # Lane-dense slabs -> (B, Lc, 4H) concat in the wrapper (outside the kernel).
    return jnp.concatenate([oc[:, :Lc, :H], oa[:, :Lc, :H],
                            oca[:, :Lc, :H], ocb[:, :Lc, :H]], axis=-1)


def _xavier_uniform(key, shape):
    # matches nn.init.xavier_uniform_ (gain=1): U(-a, a), a = sqrt(6/(fan_in+fan_out))
    fan_in, fan_out = shape[-2], shape[-1]
    a = math.sqrt(6.0 / (fan_in + fan_out))
    return jax.random.uniform(key, shape, jnp.float32, minval=-a, maxval=a)


def _reference(c, q, c_mask, q_mask, cw, qw, cqw, bias, *, mxu_dtype=jnp.bfloat16):
    """Pure-JAX reference mirroring the module (eval mode) with
    bf16-at-MXU-boundary numerics (f32 accumulation, f32 elementwise)."""
    B, Lc, H = c.shape
    Lq = q.shape[1]
    f32 = jnp.float32
    cast = lambda x: x.astype(mxu_dtype)

    s0 = jnp.sum(c * cw.reshape(1, 1, H), axis=-1, keepdims=True)        # (B,Lc,1)
    s1 = jnp.sum(q * qw.reshape(1, 1, H), axis=-1, keepdims=True)        # (B,Lq,1)
    s2 = jnp.einsum('bih,bjh->bij', cast(c), cast(q * cqw.reshape(1, 1, H)),
                    preferred_element_type=f32)
    s = s0 + jnp.swapaxes(s1, 1, 2) + s2 + bias.reshape(())
    qm = q_mask.astype(f32).reshape(B, 1, Lq)
    cm = c_mask.astype(f32).reshape(B, Lc, 1)
    sm1 = jax.nn.softmax(jnp.where(qm != 0, s, -1e30), axis=2)
    sm2 = jax.nn.softmax(jnp.where(cm != 0, s, -1e30), axis=1)
    a = jnp.einsum('bij,bjh->bih', cast(sm1), cast(q), preferred_element_type=f32)
    s1s2t = jnp.einsum('bij,bkj->bik', cast(sm1), cast(sm2),
                       preferred_element_type=f32)
    b = jnp.einsum('bik,bkh->bih', cast(s1s2t), cast(c), preferred_element_type=f32)
    return jnp.concatenate([c, a, c * a, c * b], axis=2)


if __name__ == "__main__":
    key = jax.random.PRNGKey(0)
    B, Lc, Lq, H = 2, 16, 8, 32   # hidden_size = 32

    k_c, k_q, k_cw, k_qw, k_cqw = jax.random.split(key, 5)
    c = jax.random.normal(k_c, (B, Lc, H), jnp.float32)
    q = jax.random.normal(k_q, (B, Lq, H), jnp.float32)

    # masks: first rows valid, tail padded out (deterministic)
    c_lens = jnp.array([16, 12], jnp.int32)
    q_lens = jnp.array([8, 5], jnp.int32)
    c_mask = (jnp.arange(Lc)[None, :] < c_lens[:, None]).astype(jnp.float32)
    q_mask = (jnp.arange(Lq)[None, :] < q_lens[:, None]).astype(jnp.float32)

    # parameters (deterministic xavier init, bias = 0 as in the module)
    c_weight = _xavier_uniform(k_cw, (H, 1))
    q_weight = _xavier_uniform(k_qw, (H, 1))
    cq_weight = _xavier_uniform(k_cqw, (1, H))   # module shape (1, 1, H)
    bias = jnp.zeros((1,), jnp.float32)

    out = bidaf_attention(c, q, c_mask, q_mask,
                          c_weight, q_weight, cq_weight, bias)
    out = jax.block_until_ready(out)

    ref = _reference(c, q, c_mask, q_mask, c_weight, q_weight, cq_weight, bias,
                     mxu_dtype=jnp.bfloat16)
    assert out.shape == (B, Lc, 4 * H), out.shape
    assert bool(jnp.all(jnp.isfinite(out)))
    # Tolerance covers approx-reciprocal + bf16 MXU rounding-order drift
    # (reassociated b matmul is exact math, slightly different bf16 rounding).
    assert jnp.allclose(out, ref, atol=5e-2, rtol=5e-2), \
        float(jnp.max(jnp.abs(out - ref)))
    print("KERNEL_OK")
</pallas_src>

<mosaic_0001>
module attributes {stable_mosaic.version = 11 : i64} {
  func.func @_bidaf_kernel(%arg0: i32, %arg1: memref<1x128x128xf32, #tpu.memory_space<vmem>>, %arg2: memref<1x128x128xbf16, #tpu.memory_space<vmem>>, %arg3: memref<1x128x128xbf16, #tpu.memory_space<vmem>>, %arg4: memref<1x1x128xf32, #tpu.memory_space<vmem>>, %arg5: memref<1x1x128xf32, #tpu.memory_space<vmem>>, %arg6: memref<1x128x128xf32, #tpu.memory_space<vmem>>, %arg7: memref<1x128x128xf32, #tpu.memory_space<vmem>>, %arg8: memref<1x128x128xf32, #tpu.memory_space<vmem>>, %arg9: memref<1x128x128xf32, #tpu.memory_space<vmem>>) attributes {dimension_semantics = [#tpu.dimension_semantics<parallel>], iteration_bounds = array<i64: 2>, scalar_prefetch = 0 : i64, scratch_operands = 0 : i64, tpu.core_type = #tpu.core_type<tc>, window_params = [{transform_indices = @transform_0, window_bounds = array<i64: 1, 128, 128>}, {transform_indices = @transform_1, window_bounds = array<i64: 1, 128, 128>}, {transform_indices = @transform_2, window_bounds = array<i64: 1, 128, 128>}, {transform_indices = @transform_3, window_bounds = array<i64: 1, 1, 128>}, {transform_indices = @transform_4, window_bounds = array<i64: 1, 1, 128>}, {transform_indices = @transform_5, window_bounds = array<i64: 1, 128, 128>}, {transform_indices = @transform_6, window_bounds = array<i64: 1, 128, 128>}, {transform_indices = @transform_7, window_bounds = array<i64: 1, 128, 128>}, {transform_indices = @transform_8, window_bounds = array<i64: 1, 128, 128>}]} {
    %c0 = arith.constant 0 : index
    %c0_0 = arith.constant 0 : index
    %c0_1 = arith.constant 0 : index
    %0 = vector.load %arg1[%c0, %c0_0, %c0_1] : memref<1x128x128xf32, #tpu.memory_space<vmem>>, vector<1x128x128xf32>
    %1 = vector.shape_cast %0 : vector<1x128x128xf32> to vector<128x128xf32>
    %c0_2 = arith.constant 0 : index
    %c0_3 = arith.constant 0 : index
    %c0_4 = arith.constant 0 : index
    %2 = vector.load %arg2[%c0_2, %c0_3, %c0_4] : memref<1x128x128xbf16, #tpu.memory_space<vmem>>, vector<1x128x128xbf16>
    %3 = vector.shape_cast %2 : vector<1x128x128xbf16> to vector<128x128xbf16>
    %c0_5 = arith.constant 0 : index
    %c0_6 = arith.constant 0 : index
    %c0_7 = arith.constant 0 : index
    %4 = vector.load %arg3[%c0_5, %c0_6, %c0_7] : memref<1x128x128xbf16, #tpu.memory_space<vmem>>, vector<1x128x128xbf16>
    %5 = vector.shape_cast %4 : vector<1x128x128xbf16> to vector<128x128xbf16>
    %c0_8 = arith.constant 0 : index
    %c0_9 = arith.constant 0 : index
    %c0_10 = arith.constant 0 : index
    %6 = vector.load %arg4[%c0_8, %c0_9, %c0_10] : memref<1x1x128xf32, #tpu.memory_space<vmem>>, vector<1x1x128xf32>
    %7 = vector.shape_cast %6 : vector<1x1x128xf32> to vector<1x128xf32>
    %c0_11 = arith.constant 0 : index
    %c0_12 = arith.constant 0 : index
    %c0_13 = arith.constant 0 : index
    %8 = vector.load %arg5[%c0_11, %c0_12, %c0_13] : memref<1x1x128xf32, #tpu.memory_space<vmem>>, vector<1x1x128xf32>
    %9 = vector.shape_cast %8 : vector<1x1x128xf32> to vector<1x128xf32>
    %10 = arith.truncf %1 : vector<128x128xf32> to vector<128x128xbf16>
    %cst = arith.constant dense<0.000000e+00> : vector<128x128xf32>
    %11 = tpu.matmul %10, %5, %cst {dimension_numbers = #tpu.dot_dimension_numbers<[1], [1], [0], [0], [0, 0, 1, 0], [], []>} : vector<128x128xbf16>, vector<128x128xbf16>, vector<128x128xf32> -> vector<128x128xf32>
    %cst_14 = arith.constant dense<0.000000e+00> : vector<128x128xf32>
    %12 = tpu.matmul %5, %10, %cst_14 {dimension_numbers = #tpu.dot_dimension_numbers<[1], [1], [0], [0], [0, 0, 1, 0], [], []>} : vector<128x128xbf16>, vector<128x128xbf16>, vector<128x128xf32> -> vector<128x128xf32>
    %13 = vector.broadcast %7 : vector<1x128xf32> to vector<128x128xf32>
    %14 = arith.addf %11, %13 : vector<128x128xf32>
    %cst_15 = arith.constant dense<0xFF800000> : vector<128xf32>
    %15 = vector.multi_reduction <maximumf>, %14, %cst_15 [1] : vector<128x128xf32> to vector<128xf32>
    %16 = vector.shape_cast %15 : vector<128xf32> to vector<128x1xf32>
    %17 = vector.broadcast %16 : vector<128x1xf32> to vector<128x128xf32>
    %18 = arith.subf %14, %17 : vector<128x128xf32>
    %19 = math.exp %18 : vector<128x128xf32>
    %cst_16 = arith.constant dense<0.000000e+00> : vector<128xf32>
    %20 = vector.multi_reduction <add>, %19, %cst_16 [1] : vector<128x128xf32> to vector<128xf32>
    %21 = vector.shape_cast %20 : vector<128xf32> to vector<128x1xf32>
    %22 = tpu.reciprocal %21 {approx = true} : vector<128x1xf32> -> vector<128x1xf32>
    %23 = vector.broadcast %22 : vector<128x1xf32> to vector<128x128xf32>
    %24 = arith.mulf %19, %23 : vector<128x128xf32>
    %25 = vector.broadcast %9 : vector<1x128xf32> to vector<128x128xf32>
    %26 = arith.addf %12, %25 : vector<128x128xf32>
    %cst_17 = arith.constant dense<0xFF800000> : vector<128xf32>
    %27 = vector.multi_reduction <maximumf>, %26, %cst_17 [1] : vector<128x128xf32> to vector<128xf32>
    %28 = vector.shape_cast %27 : vector<128xf32> to vector<128x1xf32>
    %29 = vector.broadcast %28 : vector<128x1xf32> to vector<128x128xf32>
    %30 = arith.subf %26, %29 : vector<128x128xf32>
    %31 = math.exp %30 : vector<128x128xf32>
    %cst_18 = arith.constant dense<0.000000e+00> : vector<128xf32>
    %32 = vector.multi_reduction <add>, %31, %cst_18 [1] : vector<128x128xf32> to vector<128xf32>
    %33 = vector.shape_cast %32 : vector<128xf32> to vector<128x1xf32>
    %34 = tpu.reciprocal %33 {approx = true} : vector<128x1xf32> -> vector<128x1xf32>
    %35 = vector.broadcast %34 : vector<128x1xf32> to vector<128x128xf32>
    %36 = arith.mulf %31, %35 : vector<128x128xf32>
    %37 = arith.truncf %24 : vector<128x128xf32> to vector<128x128xbf16>
    %cst_19 = arith.constant dense<0.000000e+00> : vector<128x128xf32>
    %38 = tpu.matmul %37, %3, %cst_19 {dimension_numbers = #tpu.dot_dimension_numbers<[1], [0], [0], [1], [0, 0, 1, 1], [], []>} : vector<128x128xbf16>, vector<128x128xbf16>, vector<128x128xf32> -> vector<128x128xf32>
    %39 = arith.truncf %36 : vector<128x128xf32> to vector<128x128xbf16>
    %cst_20 = arith.constant dense<0.000000e+00> : vector<128x128xf32>
    %40 = tpu.matmul %39, %10, %cst_20 {dimension_numbers = #tpu.dot_dimension_numbers<[1], [0], [0], [1], [0, 0, 1, 1], [], []>} : vector<128x128xbf16>, vector<128x128xbf16>, vector<128x128xf32> -> vector<128x128xf32>
    %41 = arith.truncf %40 : vector<128x128xf32> to vector<128x128xbf16>
    %cst_21 = arith.constant dense<0.000000e+00> : vector<128x128xf32>
    %42 = tpu.matmul %37, %41, %cst_21 {dimension_numbers = #tpu.dot_dimension_numbers<[1], [0], [0], [1], [0, 0, 1, 1], [], []>} : vector<128x128xbf16>, vector<128x128xbf16>, vector<128x128xf32> -> vector<128x128xf32>
    %c0_22 = arith.constant 0 : index
    %c0_23 = arith.constant 0 : index
    %c0_24 = arith.constant 0 : index
    %43 = vector.load %arg6[%c0_22, %c0_23, %c0_24] : memref<1x128x128xf32, #tpu.memory_space<vmem>>, vector<1x128x128xf32>
    %44 = vector.shape_cast %43 : vector<1x128x128xf32> to vector<128x128xf32>
    %45 = vector.shape_cast %1 : vector<128x128xf32> to vector<1x128x128xf32>
    tpu.vector_store %arg6[%c0_22, %c0_23, %c0_24], %45 {strides = array<i32>} : memref<1x128x128xf32, #tpu.memory_space<vmem>>, vector<1x128x128xf32>,
    %c0_25 = arith.constant 0 : index
    %c0_26 = arith.constant 0 : index
    %c0_27 = arith.constant 0 : index
    %46 = vector.load %arg7[%c0_25, %c0_26, %c0_27] : memref<1x128x128xf32, #tpu.memory_space<vmem>>, vector<1x128x128xf32>
    %47 = vector.shape_cast %46 : vector<1x128x128xf32> to vector<128x128xf32>
    %48 = vector.shape_cast %38 : vector<128x128xf32> to vector<1x128x128xf32>
    tpu.vector_store %arg7[%c0_25, %c0_26, %c0_27], %48 {strides = array<i32>} : memref<1x128x128xf32, #tpu.memory_space<vmem>>, vector<1x128x128xf32>,
    %49 = arith.mulf %1, %38 : vector<128x128xf32>
    %c0_28 = arith.constant 0 : index
    %c0_29 = arith.constant 0 : index
    %c0_30 = arith.constant 0 : index
    %50 = vector.load %arg8[%c0_28, %c0_29, %c0_30] : memref<1x128x128xf32, #tpu.memory_space<vmem>>, vector<1x128x128xf32>
    %51 = vector.shape_cast %50 : vector<1x128x128xf32> to vector<128x128xf32>
    %52 = vector.shape_cast %49 : vector<128x128xf32> to vector<1x128x128xf32>
    tpu.vector_store %arg8[%c0_28, %c0_29, %c0_30], %52 {strides = array<i32>} : memref<1x128x128xf32, #tpu.memory_space<vmem>>, vector<1x128x128xf32>,
    %53 = arith.mulf %1, %42 : vector<128x128xf32>
    %c0_31 = arith.constant 0 : index
    %c0_32 = arith.constant 0 : index
    %c0_33 = arith.constant 0 : index
    %54 = vector.load %arg9[%c0_31, %c0_32, %c0_33] : memref<1x128x128xf32, #tpu.memory_space<vmem>>, vector<1x128x128xf32>
    %55 = vector.shape_cast %54 : vector<1x128x128xf32> to vector<128x128xf32>
    %56 = vector.shape_cast %53 : vector<128x128xf32> to vector<1x128x128xf32>
    tpu.vector_store %arg9[%c0_31, %c0_32, %c0_33], %56 {strides = array<i32>} : memref<1x128x128xf32, #tpu.memory_space<vmem>>, vector<1x128x128xf32>,
    return
  }
  func.func @transform_0(%arg0: i32) -> (i32, i32, i32) {
    %c0_i32 = arith.constant 0 : i32
    %c0_i32_0 = arith.constant 0 : i32
    %c0_i32_1 = arith.constant 0 : i32
    return %arg0, %c0_i32, %c0_i32_0 : i32, i32, i32
  }
  func.func @transform_1(%arg0: i32) -> (i32, i32, i32) {
    %c0_i32 = arith.constant 0 : i32
    %c0_i32_0 = arith.constant 0 : i32
    %c0_i32_1 = arith.constant 0 : i32
    return %arg0, %c0_i32, %c0_i32_0 : i32, i32, i32
  }
  func.func @transform_2(%arg0: i32) -> (i32, i32, i32) {
    %c0_i32 = arith.constant 0 : i32
    %c0_i32_0 = arith.constant 0 : i32
    %c0_i32_1 = arith.constant 0 : i32
    return %arg0, %c0_i32, %c0_i32_0 : i32, i32, i32
  }
  func.func @transform_3(%arg0: i32) -> (i32, i32, i32) {
    %c0_i32 = arith.constant 0 : i32
    %c0_i32_0 = arith.constant 0 : i32
    %c0_i32_1 = arith.constant 0 : i32
    return %arg0, %c0_i32, %c0_i32_0 : i32, i32, i32
  }
  func.func @transform_4(%arg0: i32) -> (i32, i32, i32) {
    %c0_i32 = arith.constant 0 : i32
    %c0_i32_0 = arith.constant 0 : i32
    %c0_i32_1 = arith.constant 0 : i32
    return %arg0, %c0_i32, %c0_i32_0 : i32, i32, i32
  }
  func.func @transform_5(%arg0: i32) -> (i32, i32, i32) {
    %c0_i32 = arith.constant 0 : i32
    %c0_i32_0 = arith.constant 0 : i32
    %c0_i32_1 = arith.constant 0 : i32
    return %arg0, %c0_i32, %c0_i32_0 : i32, i32, i32
  }
  func.func @transform_6(%arg0: i32) -> (i32, i32, i32) {
    %c0_i32 = arith.constant 0 : i32
    %c0_i32_0 = arith.constant 0 : i32
    %c0_i32_1 = arith.constant 0 : i32
    return %arg0, %c0_i32, %c0_i32_0 : i32, i32, i32
  }
  func.func @transform_7(%arg0: i32) -> (i32, i32, i32) {
    %c0_i32 = arith.constant 0 : i32
    %c0_i32_0 = arith.constant 0 : i32
    %c0_i32_1 = arith.constant 0 : i32
    return %arg0, %c0_i32, %c0_i32_0 : i32, i32, i32
  }
  func.func @transform_8(%arg0: i32) -> (i32, i32, i32) {
    %c0_i32 = arith.constant 0 : i32
    %c0_i32_0 = arith.constant 0 : i32
    %c0_i32_1 = arith.constant 0 : i32
    return %arg0, %c0_i32, %c0_i32_0 : i32, i32, i32
  }
}

</mosaic_0001>

<bundles_post_ra>
// kernel: tpu_custom_call.1
= control target key start
LH: loop header
LB: loop body
LE: loop exit
PB: predicated region body
PF: predicated region fallthrough
CT: control target
= control target key end

     0   :  { %s3611_s0 = inlined_call_operand.hbm [shape: f32[2,128,128], index: 0, kind: input, shape index: {}]   ;;  %s3612_s1 = inlined_call_operand.hbm [shape: bf16[2,128,128], index: 1, kind: input, shape index: {}]   ;;  %s3613_s2 = inlined_call_operand.hbm [shape: bf16[2,128,128], index: 2, kind: input, shape index: {}]   ;;  %s3614_s3 = inlined_call_operand.vmem [shape: f32[2,1,128], index: 3, kind: input, shape index: {}]   ;;  %s3615_s4 = inlined_call_operand.vmem [shape: f32[2,1,128], index: 4, kind: input, shape index: {}]   ;;  %s3616_s5 = inlined_call_operand.hbm [shape: f32[2,128,128], index: 5, kind: output, shape index: {0}]   ;;  %s3617_s6 = inlined_call_operand.hbm [shape: f32[2,128,128], index: 6, kind: output, shape index: {1}]   ;;  %s3618_s7 = inlined_call_operand.hbm [shape: f32[2,128,128], index: 7, kind: output, shape index: {2}]   ;;  %s3619_s8 = inlined_call_operand.hbm [shape: f32[2,128,128], index: 8, kind: output, shape index: {3}]  }
   0x1   :  { %3632 = sst [smem:[#allocation24_spill]] %s3612_s1 }
   0x2   :  { %14 = vsyncpa [#allocation3], 0 }
   0x3   :  { %16 = vsyncpa [#allocation3 + $0x1], 0 }
   0x4   :  { %17 = vsyncpa [#allocation6], 0 }
   0x5   :  { %19 = vsyncpa [#allocation6 + $0x1], 0 }
   0x6   :  { %20 = vsyncpa [#allocation4], 0 }
   0x7   :  { %22 = vsyncpa [#allocation4 + $0x1], 0 }
   0x8   :  { %23 = vsyncpa [#allocation10], 0 }
   0x9   :  { %25 = vsyncpa [#allocation10 + $0x1], 0 }
   0xa   :  { %26 = vsyncpa [#allocation13], 0 }
   0xb   :  { %28 = vsyncpa [#allocation13 + $0x1], 0  ;;  %s2669_s27 = smov 0   ;;  %s2671_s28 = smov 0  }
   0xc   :  { %s2673_s29 = smov 0   ;;  %s2675_s30 = smov 0  }
   0xd LB: > { %3633 = sst [smem:[#allocation19_spill]] %s2597_s27  ;;  %s2690_s9 = sadd.s32 4294967295, %s2609_s30   ;;  %s2609_s30 = sphi %s2675_s30, %s3657_s30   ;;  %s2605_s29 = sphi %s2673_s29, %s3659_s29   ;;  %s2601_s28 = sphi %s2671_s28, %s3661_s28   ;;  %s2597_s27 = sphi %s2669_s27, %s3660_s27  }
   0xe   : > { %3634 = sst [smem:[#allocation20_spill]] %s2605_s29  ;;  %s3620_s10 = sadd.s32 4294967294, %s2609_s30  }
   0xf   : > { %s2694_s11 = sadd.s32 1, %s2609_s30   ;;  %s41_s12 = sadd.s32 1, %s2605_s29 }
  0x10   : > { %3635 = sst [smem:[#allocation21_spill]] %s2694_s11  ;;  %s38_s13 = ssub.s32 %s2609_s30, %s2694_s11 }
  0x11   : > { %p48_p0 = scmp.ne.s32.totalorder %s2605_s29, %s2601_s28  ;;  %p39_p1 = scmp.eq.s32.totalorder %s38_s13, 0 }
  0x12   : > { %p49_p2 = scmp.eq.s32.totalorder %s2609_s30, 0  ;;  %p54_p3 = scmp.ne.s32.totalorder %s2601_s28, %s2597_s27 }
  0x13   : > { %p55_p4 = scmp.eq.s32.totalorder %s2690_s9, 0  ;;  %p182_p7 = scmp.eq.s32.totalorder %s2690_s9, 1 }
  0x14   : > { %s2706_s14 = scalar_select %p39_p1, %s2605_s29, %s41_s12  }
  0x15   : > { %p50_p5 = por %p49_p2, %p48_p0  ;;  %p2708_p6 = por %p55_p4, %p54_p3 }
  0x16   : > { %3636 = sst [smem:[#allocation22_spill]] %s2706_s14  ;;  %p188_p8 = scmp.eq.s32.totalorder %s3620_s10, 1 }
  0x17   : > { %s3637_s15 = scalar_select %p2708_p6, 1, 0 }
  0x18   : > { %p2173_p10 = scmp.lt.s32.totalorder %s2609_s30, 2  ;;  %p2717_p11 = por %p182_p7, %p48_p0 }
  0x19   : > { %p2721_p12 = por %p188_p8, %p54_p3  ;;  %s2726_s18 = sand.u32 1, %s2605_s29  }
  0x1a   : > { %s3638_s16 = scalar_select %p2717_p11, 1, 0 }
  0x1b   : > { %s3639_s17 = scalar_select %p2721_p12, 1, 0 }
  0x1c   : > { %p2728_p13 = pnand %p2173_p10, %p50_p5  ;;  %s307_s20 = sand.u32 1, %s2609_s30  }
  0x1d   : > { %3640 = sst [smem:[#allocation23_spill]] %s3639_s17  ;;  %s3621_s21 = sshll.u32 %s2726_s18, 6 }
  0x1e   : > { %s3622_s22 = sshll.u32 %s2609_s30, 10  ;;  %s3642_s1 = sld [smem:[#allocation24_spill]] }
  0x1f   : > { %s311_s26 = scalar_lea.vmem [#allocation5], %s3621_s21  ;;  %s2746_s13 = scalar_lea.sflag [#allocation6], %s307_s20 }
  0x20   : > { %s318_s12 = sshll.u32 %s311_s26, 4  ;;  %p2752_p1 = pneg %p2728_p13  ;;  %s2744_s12 = int_to_ptr.vmem [resolvable:$true] %s318_s12 }
  0x24   : > { %s2740_s25 = scalar_lea.hbm %s3642_s1, %s3622_s22  ;;  %s2362_s21 = scalar_lea.hbm %s3642_s1, 2048 }
  0x25   : > { %s2357_s10 = scalar_lea.hbm %s2740_s25, 1024  ;;  %p2363_p4 = scmp.lt.u32.totalorder %s2740_s25, %s3642_s1 }
  0x26   : > { %p2358_p0 = scmp.ne.s32.totalorder %s2740_s25, %s2357_s10  ;;  %p2364_p5 = scmp.lt.u32.totalorder %s2362_s21, %s2357_s10 }
  0x27   : > { %p2366_p8 = scmp.lt.u32.totalorder %s2357_s10, %s2740_s25 }
  0x28   : > { %p2360_p2 = pnand %p2752_p1, %p2358_p0  ;;  %p2365_p7 = por %p2364_p5, %p2363_p4 }
  0x2a   : > { %p2361_p3 = pneg %p2360_p2  ;;  %p2367_p10 = por %p2366_p8, %p2365_p7 }
  0x2c   : > { %p2368_p9 = pnand %p2367_p10, %p2361_p3 }
  0x2e   : > { %2371 = shalt.err (!%p2368_p9)
}
  0x2f   : > { %s2372_s20 = scalar_lea.vmem %s2744_s12, 1024  ;;  %s2611_s23 = smov [#allocation5]  }
  0x30   : > { %p2373_p0 = scmp.ne.s32.totalorder %s2744_s12, %s2372_s20  ;;  %s2377_s24 = sshll.u32 %s2611_s23, 4  ;;  %s2378_s24 = int_to_ptr.vmem [resolvable:$false] %s2377_s24 }
  0x31   : > { %s2379_s22 = scalar_lea.vmem %s2378_s24, 2048  ;;  %p2380_p11 = scmp.lt.s32.totalorder %s2744_s12, %s2378_s24 }
  0x32   : > { %p2375_p2 = pnand %p2373_p0, %p2752_p1  ;;  %p2381_p6 = scmp.lt.s32.totalorder %s2379_s22, %s2372_s20 }
  0x34   : > { %p2376_p12 = pneg %p2375_p2  ;;  %p2382_p4 = por %p2381_p6, %p2380_p11 }
  0x36   : > { %p2383_p5 = pnand %p2382_p4, %p2376_p12 }
  0x38   : > { %2386 = shalt.err (!%p2383_p5)
}
  0x39   : > { %s3630_s10 = smov 64   ;;  %s3631_s21 = smov 4  }
  0x3a   : > { %2156 = dma.hbm_to_vmem [thread:$0]  (!%p2728_p13), %s2740_s25, 1024, %s2744_s12, %s2746_s13, %s3630_s10, %s3630_s10, %s3631_s21  }
  0x3b   : > { %s3644_s26 = sshll.u32 %s2609_s30, 10  ;;  %s3645_s22 = sshll.u32 %s2726_s18, 6 }
  0x3c   : > { %s2784_s24 = scalar_lea.hbm %s3613_s2, %s3644_s26  ;;  %s332_s1 = scalar_lea.vmem [#allocation7], %s3645_s22 }
  0x3d   : > { %s339_s29 = sshll.u32 %s332_s1, 4  ;;  %p1833_p6 = scmp.ge.s32.totalorder %s2609_s30, 1  ;;  %s2788_s29 = int_to_ptr.vmem [resolvable:$true] %s339_s29 }
  0x3e   : > { %p359_p9 = scmp.lt.s32.totalorder %s2609_s30, 3  ;;  %s1824_s11 = sshll.u32 %s2726_s18, 7 }
  0x3f   : > { %s1873_s17 = sshll.u32 %s2609_s30, 11  ;;  %s290_s1 = scalar_lea.vmem [#allocation2], %s1824_s11 }
  0x40   : > { %p2794_p11 = pnand %p1833_p6, %p359_p9  ;;  %s2801_s20 = scalar_lea.hbm %s3611_s0, %s1873_s17 }
  0x41   : > { %s297_s26 = sshll.u32 %s290_s1, 4  ;;  %s287_s23 = scalar_lea.sflag [#allocation3], %s2726_s18  ;;  %s2803_s26 = int_to_ptr.vmem [resolvable:$true] %s297_s26 }
  0x42   : > { %s3646_s27 = scalar_select %p2794_p11, 1, 0 }
  0x43   : > { %s2387_s22 = scalar_lea.hbm %s2801_s20, 2048  ;;  %s2392_s25 = scalar_lea.hbm %s3611_s0, 4096 }
  0x44   : > { %p2388_p12 = scmp.ne.s32.totalorder %s2801_s20, %s2387_s22  ;;  %p2393_p8 = scmp.lt.u32.totalorder %s2801_s20, %s3611_s0 }
  0x45   : > { %p2394_p10 = scmp.lt.u32.totalorder %s2392_s25, %s2387_s22  ;;  %p2396_p2 = scmp.lt.u32.totalorder %s2387_s22, %s2801_s20 }
  0x46   : > { %p2390_p3 = pnand %p2388_p12, %p2752_p1 }
  0x47   : > { %p2395_p0 = por %p2394_p10, %p2393_p8 }
  0x48   : > { %p2391_p7 = pneg %p2390_p3 }
  0x49   : > { %p2397_p4 = por %p2396_p2, %p2395_p0 }
  0x4b   : > { %p2398_p5 = pnand %p2397_p4, %p2391_p7 }
  0x4d   : > { %2401 = shalt.err (!%p2398_p5)
}
  0x4e   : > { %s2402_s11 = scalar_lea.vmem %s2803_s26, 2048  ;;  %s2614_s10 = smov [#allocation2]  }
  0x4f   : > { %p2403_p6 = scmp.ne.s32.totalorder %s2803_s26, %s2402_s11  ;;  %s2407_s21 = sshll.u32 %s2614_s10, 4  ;;  %s2408_s21 = int_to_ptr.vmem [resolvable:$false] %s2407_s21 }
  0x50   : > { %s2409_s1 = scalar_lea.vmem %s2408_s21, 4096  ;;  %p2410_p3 = scmp.lt.s32.totalorder %s2803_s26, %s2408_s21 }
  0x51   : > { %p2405_p9 = pnand %p2403_p6, %p2752_p1  ;;  %p2411_p11 = scmp.lt.s32.totalorder %s2409_s1, %s2402_s11 }
  0x53   : > { %p2406_p12 = pneg %p2405_p9  ;;  %p2412_p8 = por %p2411_p11, %p2410_p3 }
  0x55   : > { %p2413_p10 = pnand %p2412_p8, %p2406_p12 }
  0x57   : > { %2416 = shalt.err (!%p2413_p10)
}
  0x58   : > { %s2615_s22 = smov 128   ;;  %s2616_s25 = smov 8  }
  0x59   : > { %2153 = dma.hbm_to_vmem [thread:$0]  (!%p2728_p13), %s2801_s20, 2048, %s2803_s26, %s287_s23, %s2615_s22, %s2615_s22, %s2616_s25  }
  0x5a   : > { %s2417_s17 = scalar_lea.hbm %s2784_s24, 1024  ;;  %s2422_s10 = scalar_lea.hbm %s3613_s2, 2048 }
  0x5b   : > { %p2418_p7 = scmp.ne.s32.totalorder %s2784_s24, %s2417_s17  ;;  %p2423_p2 = scmp.lt.u32.totalorder %s2784_s24, %s3613_s2 }
  0x5c   : > { %p2424_p4 = scmp.lt.u32.totalorder %s2422_s10, %s2417_s17  ;;  %p2426_p6 = scmp.lt.u32.totalorder %s2417_s17, %s2784_s24 }
  0x5d   : > { %p2420_p11 = pnand %p2418_p7, %p2752_p1 }
  0x5e   : > { %p2425_p5 = por %p2424_p4, %p2423_p2 }
  0x5f   : > { %p2421_p0 = pneg %p2420_p11 }
  0x60   : > { %p2427_p9 = por %p2426_p6, %p2425_p5 }
  0x62   : > { %p2428_p12 = pnand %p2427_p9, %p2421_p0 }
  0x64   : > { %2431 = shalt.err (!%p2428_p12)
}
  0x65   : > { %s2432_s18 = scalar_lea.vmem %s2788_s29, 1024  ;;  %s2617_s20 = smov [#allocation7]  }
  0x66   : > { %p2433_p3 = scmp.ne.s32.totalorder %s2788_s29, %s2432_s18  ;;  %s2437_s26 = sshll.u32 %s2617_s20, 4  ;;  %s2438_s26 = int_to_ptr.vmem [resolvable:$false] %s2437_s26 }
  0x67   : > { %s2439_s23 = scalar_lea.vmem %s2438_s26, 2048  ;;  %p2440_p7 = scmp.lt.s32.totalorder %s2788_s29, %s2438_s26 }
  0x68   : > { %p2435_p8 = pnand %p2433_p3, %p2752_p1  ;;  %p2441_p11 = scmp.lt.s32.totalorder %s2439_s23, %s2432_s18 }
  0x6a   : > { %p2436_p10 = pneg %p2435_p8  ;;  %p2442_p2 = por %p2441_p11, %p2440_p7 }
  0x6c   : > { %p2443_p4 = pnand %p2442_p2, %p2436_p10 }
  0x6e   : > { %2446 = shalt.err (!%p2443_p4)
}
  0x6f   : > { %s3647_s22 = smov 4   ;;  %s3648_s25 = smov 64  }
  0x70   : > { %2159 = dma.hbm_to_vmem [thread:$0]  (!%p2728_p13), %s2784_s24, 1024, %s2788_s29, %s2746_s13, %s3648_s25, %s3648_s25, %s3647_s22  }
  0x71   : > { %p3649_p1 = scmp.ne.s32.totalorder %s3646_s27, 0 }
  0x72   : > { %s2857_s14 = sand.u32 (!%p3649_p1), 1, %s2601_s28   ;;  %p3650_p0 = scmp.ne.s32.totalorder (!%p3649_p1), %s3637_s15, 0 }
  0x73   : > { %363 = sbr.rel (%p3649_p1) target bundleno = 1225 (0x4c9), region = 40  ;;  %s2860_s17 = sshll.u32 (!%p3649_p1), %s2857_s14, 7 }
  0x74   : > { %s366_s19 = scalar_lea.sflag (!%p3649_p1), [#allocation3], %s2857_s14  ;;  %s2864_s12 = scalar_lea.vmem (!%p3649_p1), [#allocation2], %s2860_s17 }
  0x7a   : > { %2576 = dma.done.wait (%p3650_p0), %s366_s19, 2048  }
  0x7b   : > { %2578 = vsyncadd (%p3650_p0), %s366_s19, 4294965248  ;;  %s374_s27 = sand.u32 1, %s2690_s9   ;;  %s1835_s29 = sshll.u32 %s2857_s14, 6 }
  0x7c   : > { %s375_s13 = scalar_lea.sflag [#allocation6], %s374_s27  ;;  %s2876_s24 = scalar_lea.vmem [#allocation5], %s1835_s29 }
  0x7d   : > { %2580 = dma.done.wait (%p3650_p0), %s375_s13, 2048  }
  0x7e   : > { %2582 = vsyncadd (%p3650_p0), %s375_s13, 4294965248  ;;  %v2883_v0 = vld [vmem:[%s2864_s12] sm:$0xff]  ;;  %v2886_v1 = vld [vmem:[%s2864_s12 + $0x8] sm:$0xff]  ;;  %s2896_s15 = scalar_lea.vmem [#allocation8], %s2860_s17  ;;  %s2977_s11 = scalar_lea.vmem [#allocation7], %s1835_s29 }
  0x7f   : > { %v2889_v2 = vld [vmem:[%s2864_s12 + $0x10] sm:$0xff]  ;;  %v2893_v3 = vpack.c.bf16 %v2886_v1, %v2883_v0  ;;  %1421 = vst [vmem:[%s2896_s15] sm:$0xff] %v2883_v0  ;;  %1422 = vst [vmem:[%s2896_s15 + $0x8] sm:$0xff] %v2886_v1  ;;  %v2903_v4 = vld [vmem:[%s2864_s12 + $0x18] sm:$0xff]  ;;  %p451_p13 = scmp.lt.s32.totalorder %s2690_s9, 1  ;;  %s3356_s22 = sshll.u32 %s2690_s9, 11 }
  0x80   : > { %1423 = vst [vmem:[%s2896_s15 + $0x10] sm:$0xff] %v2889_v2  ;;  %v2908_v5 = vld [vmem:[%s2864_s12 + $0x20] sm:$0xff]  ;;  %v2911_v6 = vld [vmem:[%s2864_s12 + $0x28] sm:$0xff]  ;;  %v2915_v7 = vpack.c.bf16 %v2903_v4, %v2889_v2  ;;  %1424 = vst [vmem:[%s2896_s15 + $0x18] sm:$0xff] %v2903_v4  ;;  %s1546_s29 = sshll.u32 %s2896_s15, 4  ;;  %s1518_s13 = scalar_lea.sflag [#allocation4], %s2857_s14  ;;  %s3365_s29 = int_to_ptr.vmem [resolvable:$true] %s1546_s29 }
  0x81   : > { %1425 = vst [vmem:[%s2896_s15 + $0x20] sm:$0xff] %v2908_v5  ;;  %1426 = vst [vmem:[%s2896_s15 + $0x28] sm:$0xff] %v2911_v6  ;;  %v2924_v8 = vld [vmem:[%s2864_s12 + $0x30] sm:$0xff]  ;;  %v2927_v9 = vld [vmem:[%s2864_s12 + $0x38] sm:$0xff]  ;;  %1992 = vmatprep.subr.bf16.mxu1 %v2893_v3  ;;  %1976 = vmatprep.mubr.bf16.mxu0 %v2893_v3  ;;  %v510_v20 = vpack.c.bf16 %v2911_v6, %v2908_v5  ;;  %s3009_s10 = scalar_select %p451_p13, %s2690_s9, 1 }
  0x82   : > { %v2930_v10 = vld [vmem:[%s2864_s12 + $0x40] sm:$0xff]  ;;  %1427 = vst [vmem:[%s2896_s15 + $0x30] sm:$0xff] %v2924_v8  ;;  %1428 = vst [vmem:[%s2896_s15 + $0x38] sm:$0xff] %v2927_v9  ;;  %v2938_v11 = vld [vmem:[%s2864_s12 + $0x48] sm:$0xff]  ;;  %1993 = vmatpush3.bf16.xpose.msra.mxu1 %v2893_v3  ;;  %v511_v22 = vpack.c.bf16 %v2927_v9, %v2924_v8  ;;  %p3651_p6 = scmp.ne.s32.totalorder %s3638_s16, 0 }
  0x83   : > { %1429 = vst [vmem:[%s2896_s15 + $0x40] sm:$0xff] %v2930_v10  ;;  %v2943_v12 = vld [vmem:[%s2864_s12 + $0x50] sm:$0xff]  ;;  %v2946_v13 = vld [vmem:[%s2864_s12 + $0x58] sm:$0xff]  ;;  %1430 = vst [vmem:[%s2896_s15 + $0x48] sm:$0xff] %v2938_v11  ;;  %1994 = vmatprep.subr.bf16.mxu1 %v2915_v7  ;;  %v512_v24 = vpack.c.bf16 %v2938_v11, %v2930_v10  ;;  %s456_s18 = scalar_lea.vmem %s3615_s4, %s3009_s10  ;;  %s453_s23 = scalar_lea.vmem %s3614_s3, %s3009_s10 }
  0x84   : > { %1431 = vst [vmem:[%s2896_s15 + $0x50] sm:$0xff] %v2943_v12  ;;  %1432 = vst [vmem:[%s2896_s15 + $0x58] sm:$0xff] %v2946_v13  ;;  %v2957_v14 = vld [vmem:[%s2864_s12 + $0x60] sm:$0xff]  ;;  %v2960_v15 = vld [vmem:[%s2864_s12 + $0x68] sm:$0xff]  ;;  %v513_v26 = vpack.c.bf16 %v2946_v13, %v2943_v12 }
  0x85   : > { %v2963_v16 = vld [vmem:[%s2864_s12 + $0x70] sm:$0xff]  ;;  %1433 = vst [vmem:[%s2896_s15 + $0x60] sm:$0xff] %v2957_v14  ;;  %1434 = vst [vmem:[%s2896_s15 + $0x68] sm:$0xff] %v2960_v15  ;;  %v2971_v17 = vld [vmem:[%s2864_s12 + $0x78] sm:$0xff]  ;;  %v514_v28 = vpack.c.bf16 %v2960_v15, %v2957_v14  ;;  %s3362_s12 = scalar_lea.hbm %s3616_s5, %s3356_s22 }
  0x86   : > { %1435 = vst [vmem:[%s2896_s15 + $0x70] sm:$0xff] %v2963_v16  ;;  %1436 = vst [vmem:[%s2896_s15 + $0x78] sm:$0xff] %v2971_v17  ;;  %v2213_v18 = vld [vmem:[%s2977_s11] sm:$0xff]   ;;  %v2214_v19 = vld [vmem:[%s2977_s11 + $0x8] sm:$0xff]   ;;  %v515_v30 = vpack.c.bf16 %v2971_v17, %v2963_v16 }
  0x87   : > { %2008 = vmatprep.mubr.bf16.mxu1 %v2213_v18  ;;  %1960 = vmatprep.subr.bf16.mxu0 %v2213_v18  ;;  %v2215_v21 = vld [vmem:[%s2977_s11 + $0x10] sm:$0xff]   ;;  %v2216_v23 = vld [vmem:[%s2977_s11 + $0x18] sm:$0xff]   ;;  %v2217_v25 = vld [vmem:[%s2977_s11 + $0x20] sm:$0xff]  }
  0x88   : > { %1961 = vmatpush3.bf16.xpose.msra.mxu0 %v2213_v18  ;;  %v2218_v27 = vld [vmem:[%s2977_s11 + $0x28] sm:$0xff]   ;;  %v2219_v29 = vld [vmem:[%s2977_s11 + $0x30] sm:$0xff]   ;;  %v2220_v31 = vld [vmem:[%s2977_s11 + $0x38] sm:$0xff]   ;;  %s2618_s11 = smov [#allocation8]  }
  0x89   : > { %1962 = vmatprep.subr.bf16.mxu0 %v2214_v19  ;;  %v1850_v32 = vld [vmem:[%s456_s18] ss:$0 sm:$0xff]  ;;  %s2451_s10 = sshll.u32 %s2618_s11, 4  ;;  %s2452_s10 = int_to_ptr.vmem [resolvable:$false] %s2451_s10 }
  0x8a   : > { %1995 = vmatpush3.bf16.xpose.msra.mxu1 %v2915_v7  ;;  %s2453_s21 = scalar_lea.vmem %s2452_s10, 4096  ;;  %p2454_p3 = scmp.lt.s32.totalorder %s3365_s29, %s2452_s10 }
  0x8b   : > { %1996 = vmatprep.subr.bf16.mxu1 %v510_v20 }
  0x90   : > { %1963 = vmatpush3.bf16.xpose.msra.mxu0 %v2214_v19 }
  0x91   : > { %1964 = vmatprep.subr.bf16.mxu0 %v2215_v21 }
  0x92   : > { %1997 = vmatpush3.bf16.xpose.msra.mxu1 %v510_v20 }
  0x93   : > { %1998 = vmatprep.subr.bf16.mxu1 %v511_v22 }
  0x98   : > { %1965 = vmatpush3.bf16.xpose.msra.mxu0 %v2215_v21 }
  0x99   : > { %1966 = vmatprep.subr.bf16.mxu0 %v2216_v23 }
  0x9a   : > { %1999 = vmatpush3.bf16.xpose.msra.mxu1 %v511_v22 }
  0x9b   : > { %2000 = vmatprep.subr.bf16.mxu1 %v512_v24 }
  0xa0   : > { %1967 = vmatpush3.bf16.xpose.msra.mxu0 %v2216_v23 }
  0xa1   : > { %1968 = vmatprep.subr.bf16.mxu0 %v2217_v25 }
  0xa2   : > { %2001 = vmatpush3.bf16.xpose.msra.mxu1 %v512_v24 }
  0xa3   : > { %2002 = vmatprep.subr.bf16.mxu1 %v513_v26 }
  0xa8   : > { %1969 = vmatpush3.bf16.xpose.msra.mxu0 %v2217_v25 }
  0xa9   : > { %1970 = vmatprep.subr.bf16.mxu0 %v2218_v27 }
  0xaa   : > { %2003 = vmatpush3.bf16.xpose.msra.mxu1 %v513_v26 }
  0xab   : > { %2004 = vmatprep.subr.bf16.mxu1 %v514_v28 }
  0xb0   : > { %1971 = vmatpush3.bf16.xpose.msra.mxu0 %v2218_v27 }
  0xb1   : > { %1972 = vmatprep.subr.bf16.mxu0 %v2219_v29 }
  0xb2   : > { %2005 = vmatpush3.bf16.xpose.msra.mxu1 %v514_v28 }
  0xb3   : > { %2006 = vmatprep.subr.bf16.mxu1 %v515_v30 }
  0xb8   : > { %1973 = vmatpush3.bf16.xpose.msra.mxu0 %v2219_v29 }
  0xb9   : > { %1974 = vmatprep.subr.bf16.mxu0 %v2220_v31 }
  0xba   : > { %2007 = vmatpush3.bf16.xpose.msra.mxu1 %v515_v30 }
  0xbb   : > { %2056 = vmatprep.subr.bf16.mxu1 %v2893_v3 }
  0xc0   : > { %1975 = vmatpush3.bf16.xpose.msra.mxu0 %v2220_v31 }
  0xc1   : > { %2009 = vmatmul.mubr.bf16.vlgmr.msra.gmra.mrb[0].mxu1 %v2214_v19 }
  0xc2   : > { %2012 = vmatprep.mubr.bf16.mxu1 %v2215_v21  ;;  %2057 = vmatpush3.bf16.msra.mxu1 %v2893_v3 }
  0xc3   : > { %2058 = vmatprep.subr.bf16.mxu1 %v2915_v7 }
  0xc6   : > { %2059 = vmatpush3.bf16.msra.mxu1 %v2915_v7 }
  0xc7   : > { %1977 = vmatmul.mubr.bf16.vlgmr.msra.gmra.mrb[0].mxu0 %v2915_v7  ;;  %2060 = vmatprep.subr.bf16.mxu1 %v510_v20 }
  0xc8   : > { %1980 = vmatprep.mubr.bf16.mxu0 %v510_v20 }
  0xc9   : > { %2013 = vmatmul.mubr.bf16.gmra.mrb[4].mxu1 %v2216_v23 }
  0xca   : > { %2016 = vmatprep.mubr.bf16.mxu1 %v2217_v25  ;;  %2061 = vmatpush3.bf16.msra.mxu1 %v510_v20 }
  0xcb   : > { %2062 = vmatprep.subr.bf16.mxu1 %v511_v22 }
  0xce   : > { %2063 = vmatpush3.bf16.msra.mxu1 %v511_v22 }
  0xcf   : > { %1981 = vmatmul.mubr.bf16.gmra.mrb[4].mxu0 %v511_v22  ;;  %2064 = vmatprep.subr.bf16.mxu1 %v512_v24 }
  0xd0   : > { %1984 = vmatprep.mubr.bf16.mxu0 %v512_v24 }
  0xd1   : > { %2017 = vmatmul.mubr.bf16.gmra.mrb[8].mxu1 %v2218_v27 }
  0xd2   : > { %2020 = vmatprep.mubr.bf16.mxu1 %v2219_v29  ;;  %2065 = vmatpush3.bf16.msra.mxu1 %v512_v24 }
  0xd3   : > { %2066 = vmatprep.subr.bf16.mxu1 %v513_v26 }
  0xd6   : > { %2067 = vmatpush3.bf16.msra.mxu1 %v513_v26 }
  0xd7   : > { %1985 = vmatmul.mubr.bf16.gmra.mrb[8].mxu0 %v513_v26  ;;  %2068 = vmatprep.subr.bf16.mxu1 %v514_v28 }
  0xd8   : > { %1988 = vmatprep.mubr.bf16.mxu0 %v514_v28 }
  0xd9   : > { %2021 = vmatmul.mubr.bf16.gmra.mrb[12].mxu1 %v2220_v31 }
  0xda   : > { %2069 = vmatpush3.bf16.msra.mxu1 %v514_v28 }
  0xdb   : > { %2070 = vmatprep.subr.bf16.mxu1 %v515_v30 }
  0xde   : > { %2071 = vmatpush3.bf16.msra.mxu1 %v515_v30 }
  0xdf   : > { %1989 = vmatmul.mubr.bf16.gmra.mrb[12].mxu0 %v515_v30 }
 0x194   : > { %v2010_v33 = vpop.f32.mrb[0].mxu1 }
 0x195   : > { %v3015_v34 = vadd.f32 %v2010_v33, %v1850_v32  ;;  %v851_v35 = vpop.f32.mrb[1].mxu1 }
 0x196   : > { %v3017_v36 = vadd.f32 %v1850_v32, %v851_v35  ;;  %v2011_v37 = vpop.f32.mrb[2].mxu1 }
 0x197   : > { %918 = vmax.xlane.f32.xlu1 %v3015_v34  ;;  %v854_v38 = vpop.f32.mrb[3].mxu1  ;;  %v3021_v39 = vadd.f32 %v2011_v37, %v1850_v32 }
 0x198   : > { %914 = vmax.xlane.f32.xlu0 %v3017_v36  ;;  %v3023_v40 = vadd.f32 %v1850_v32, %v854_v38 }
 0x19a   : > { %v3063_v7 = vpop.f32.mrb[0].mxu0 }
 0x19b   : > { %920 = vmax.xlane.f32.xlu1 %v3021_v39  ;;  %v3065_v18 = vpop.f32.mrb[1].mxu0 }
 0x19c   : > { %v2014_v41 = vpop.f32.mrb[4].mxu1  ;;  %916 = vmax.xlane.f32.xlu0 %v3023_v40  ;;  %v3067_v19 = vpop.f32.mrb[2].mxu0 }
 0x19d   : > { %v867_v42 = vpop.f32.mrb[5].mxu1  ;;  %v3032_v47 = vadd.f32 %v2014_v41, %v1850_v32  ;;  %v3069_v20 = vpop.f32.mrb[3].mxu0 }
 0x19e   : > { %v3027_v43 = vadd.f32 %v1850_v32, %v867_v42  ;;  %v2015_v44 = vpop.f32.mrb[6].mxu1 }
 0x19f   : > { %v870_v45 = vpop.f32.mrb[7].mxu1  ;;  %v3035_v48 = vadd.f32 %v2015_v44, %v1850_v32 }
 0x1a0   : > { %v3029_v46 = vadd.f32 %v1850_v32, %v870_v45  ;;  %922 = vmax.xlane.f32.xlu0 %v3027_v43 }
 0x1a2   : > { %924 = vmax.xlane.f32.xlu1 %v3029_v46  ;;  %v3071_v21 = vpop.f32.mrb[4].mxu0 }
 0x1a3   : > { %v3073_v22 = vpop.f32.mrb[5].mxu0 }
 0x1a4   : > { %v2018_v49 = vpop.f32.mrb[8].mxu1  ;;  %926 = vmax.xlane.f32.xlu0 %v3032_v47  ;;  %v3075_v23 = vpop.f32.mrb[6].mxu0 }
 0x1a5   : > { %v883_v50 = vpop.f32.mrb[9].mxu1  ;;  %v3044_v55 = vadd.f32 %v2018_v49, %v1850_v32  ;;  %v3077_v24 = vpop.f32.mrb[7].mxu0 }
 0x1a6   : > { %v3038_v51 = vadd.f32 %v1850_v32, %v883_v50  ;;  %v2019_v52 = vpop.f32.mrb[10].mxu1  ;;  %928 = vmax.xlane.f32.xlu1 %v3035_v48 }
 0x1a7   : > { %v886_v53 = vpop.f32.mrb[11].mxu1  ;;  %v3047_v56 = vadd.f32 %v2019_v52, %v1850_v32 }
 0x1a8   : > { %v3041_v54 = vadd.f32 %v1850_v32, %v886_v53  ;;  %930 = vmax.xlane.f32.xlu0 %v3038_v51 }
 0x1aa   : > { %932 = vmax.xlane.f32.xlu1 %v3041_v54  ;;  %v3079_v25 = vpop.f32.mrb[8].mxu0 }
 0x1ab   : > { %v3081_v26 = vpop.f32.mrb[9].mxu0 }
 0x1ac   : > { %v2022_v57 = vpop.f32.mrb[12].mxu1  ;;  %934 = vmax.xlane.f32.xlu0 %v3044_v55  ;;  %v3083_v27 = vpop.f32.mrb[10].mxu0 }
 0x1ad   : > { %v899_v58 = vpop.f32.mrb[13].mxu1  ;;  %v3056_v63 = vadd.f32 %v2022_v57, %v1850_v32  ;;  %v3085_v28 = vpop.f32.mrb[11].mxu0 }
 0x1ae   : > { %v3050_v59 = vadd.f32 %v1850_v32, %v899_v58  ;;  %v2023_v60 = vpop.f32.mrb[14].mxu1  ;;  %936 = vmax.xlane.f32.xlu1 %v3047_v56 }
 0x1af   : > { %v902_v61 = vpop.f32.mrb[15].mxu1  ;;  %v3059_v3 = vadd.f32 %v2023_v60, %v1850_v32 }
 0x1b0   : > { %v3053_v62 = vadd.f32 %v1850_v32, %v902_v61  ;;  %938 = vmax.xlane.f32.xlu0 %v3050_v59 }
 0x1b2   : > { %940 = vmax.xlane.f32.xlu1 %v3053_v62  ;;  %v3087_v29 = vpop.f32.mrb[12].mxu0 }
 0x1b3   : > { %v3089_v30 = vpop.f32.mrb[13].mxu0 }
 0x1b4   : > { %942 = vmax.xlane.f32.xlu0 %v3056_v63  ;;  %v3091_v31 = vpop.f32.mrb[14].mxu0 }
 0x1b5   : > { %v3093_v32 = vpop.f32.mrb[15].mxu0 }
 0x1b6   : > { %944 = vmax.xlane.f32.xlu1 %v3059_v3 }
 0x224   : > { %v919_v33 = vpop.xlane.xlu1 %918 }
 0x225   : > { %v948_v35 = vsub.f32 %v3015_v34, %v919_v33  ;;  %v915_v37 = vpop.xlane.xlu0 %914 }
 0x226   : > { %v946_v38 = vsub.f32 %v3017_v36, %v915_v37 }
 0x227   : > { %v966_v44 = vmul.f32 1.442695, %v948_v35 }
 0x228   : > { %v962_v41 = vmul.f32 1.442695, %v946_v38  ;;  %v921_v42 = vpop.xlane.xlu1 %920 }
 0x229   : > { %v949_v45 = vsub.f32 %v3021_v39, %v921_v42  ;;  %v917_v49 = vpop.xlane.xlu0 %916 }
 0x22a   : > { %2229 = vpow2.f32 %v962_v41  ;;  %v947_v50 = vsub.f32 %v3023_v40, %v917_v49 }
 0x22b   : > { %2231 = vpow2.f32 %v966_v44  ;;  %v968_v53 = vmul.f32 1.442695, %v949_v45 }
 0x22c   : > { %v964_v52 = vmul.f32 1.442695, %v947_v50 }
 0x22d   : > { %v923_v57 = vpop.xlane.xlu0 %922 }
 0x22e   : > { %2233 = vpow2.f32 %v964_v52  ;;  %v950_v58 = vsub.f32 %v3027_v43, %v923_v57 }
 0x22f   : > { %v925_v34 = vpop.xlane.xlu1 %924  ;;  %2235 = vpow2.f32 %v968_v53 }
 0x230   : > { %v970_v60 = vmul.f32 1.442695, %v950_v58  ;;  %v951_v36 = vsub.f32 %v3029_v46, %v925_v34 }
 0x231   : > { %v927_v61 = vpop.xlane.xlu0 %926 }
 0x232   : > { %2237 = vpow2.f32 %v970_v60  ;;  %v972_v33 = vmul.f32 1.442695, %v951_v36  ;;  %v952_v39 = vsub.f32 %v3032_v47, %v927_v61 }
 0x233   : > { %v929_v35 = vpop.xlane.xlu1 %928 }
 0x234   : > { %v3102_v37 = vpop.eup %2229  ;;  %v974_v40 = vmul.f32 1.442695, %v952_v39  ;;  %v953_v38 = vsub.f32 %v3035_v48, %v929_v35  ;;  %2239 = vpow2.f32 %v972_v33 }
 0x235   : > { %994 = vadd.xlane.f32.xlu0 %v3102_v37  ;;  %v931_v43 = vpop.xlane.xlu0 %930  ;;  %v3107_v42 = vpop.eup %2231 }
 0x236   : > { %2241 = vpow2.f32 %v974_v40  ;;  %v976_v41 = vmul.f32 1.442695, %v953_v38  ;;  %v954_v46 = vsub.f32 %v3038_v51, %v931_v43 }
 0x237   : > { %v933_v44 = vpop.xlane.xlu1 %932 }
 0x238   : > { %v3109_v45 = vpop.eup %2233  ;;  %v978_v47 = vmul.f32 1.442695, %v954_v46  ;;  %v955_v49 = vsub.f32 %v3041_v54, %v933_v44  ;;  %2243 = vpow2.f32 %v976_v41 }
 0x239   : > { %998 = vadd.xlane.f32.xlu0 %v3107_v42  ;;  %996 = vadd.xlane.f32.xlu1 %v3109_v45  ;;  %v935_v48 = vpop.xlane.xlu0 %934  ;;  %v3115_v53 = vpop.eup %2235 }
 0x23a   : > { %2245 = vpow2.f32 %v978_v47  ;;  %v980_v50 = vmul.f32 1.442695, %v955_v49  ;;  %v956_v52 = vsub.f32 %v3044_v55, %v935_v48  ;;  %v1841_v48 = vld [vmem:[%s453_s23] ss:$0 sm:$0xff] }
 0x23b   : > { %v937_v51 = vpop.xlane.xlu1 %936 }
 0x23c   : > { %v3117_v57 = vpop.eup %2237  ;;  %v982_v58 = vmul.f32 1.442695, %v956_v52  ;;  %v957_v34 = vsub.f32 %v3047_v56, %v937_v51  ;;  %2247 = vpow2.f32 %v980_v50  ;;  %v3161_v51 = vadd.f32 %v1841_v48, %v3065_v18 }
 0x23d   : > { %1000 = vadd.xlane.f32.xlu1 %v3115_v53  ;;  %1002 = vadd.xlane.f32.xlu0 %v3117_v57  ;;  %v939_v54 = vpop.xlane.xlu0 %938  ;;  %v3179_v18 = vadd.f32 %v1841_v48, %v3073_v22  ;;  %v3195_v22 = vadd.f32 %v1841_v48, %v3081_v26  ;;  %v3214_v26 = vadd.f32 %v3087_v29, %v1841_v48  ;;  %v2223_v29 = vld [vmem:[%s2876_s24 + $0x10] sm:$0xff]  }
 0x23e   : > { %2249 = vpow2.f32 %v982_v58  ;;  %v984_v60 = vmul.f32 1.442695, %v957_v34  ;;  %v958_v36 = vsub.f32 %v3050_v59, %v939_v54  ;;  %v3123_v61 = vpop.eup %2239  ;;  %v3166_v34 = vadd.f32 %v3063_v7, %v1841_v48 }
 0x23f   : > { %v941_v55 = vpop.xlane.xlu1 %940  ;;  %v3171_v54 = vadd.f32 %v1841_v48, %v3069_v20  ;;  %v3182_v7 = vadd.f32 %v3071_v21, %v1841_v48  ;;  %v3187_v20 = vadd.f32 %v1841_v48, %v3077_v24  ;;  %v3198_v21 = vadd.f32 %v3079_v25, %v1841_v48 }
 0x240   : > { %v3125_v33 = vpop.eup %2241  ;;  %v986_v39 = vmul.f32 1.442695, %v958_v36  ;;  %v959_v35 = vsub.f32 %v3053_v62, %v941_v55  ;;  %2251 = vpow2.f32 %v984_v60  ;;  %v3174_v60 = vadd.f32 %v3067_v19, %v1841_v48  ;;  %v2222_v36 = vld [vmem:[%s2876_s24 + $0x8] sm:$0xff]  }
 0x241   : > { %1004 = vadd.xlane.f32.xlu1 %v3123_v61  ;;  %1006 = vadd.xlane.f32.xlu0 %v3125_v33  ;;  %v943_v56 = vpop.xlane.xlu0 %942  ;;  %v3190_v19 = vadd.f32 %v3075_v23, %v1841_v48  ;;  %v3203_v24 = vadd.f32 %v1841_v48, %v3085_v28  ;;  %v3206_v23 = vadd.f32 %v3083_v27, %v1841_v48 }
 0x242   : > { %2253 = vpow2.f32 %v986_v39  ;;  %v988_v40 = vmul.f32 1.442695, %v959_v35  ;;  %v960_v38 = vsub.f32 %v3056_v63, %v943_v56  ;;  %v3131_v43 = vpop.eup %2243  ;;  %v3211_v25 = vadd.f32 %v1841_v48, %v3089_v30  ;;  %v2221_v30 = vld [vmem:[%s2876_s24] sm:$0xff]  }
 0x243   : > { %v945_v59 = vpop.xlane.xlu1 %944  ;;  %v3219_v28 = vadd.f32 %v1841_v48, %v3093_v32  ;;  %v3222_v27 = vadd.f32 %v3091_v31, %v1841_v48  ;;  %2024 = vmatprep.subr.bf16.mxu0 %v2221_v30 }
 0x244   : > { %v3133_v41 = vpop.eup %2245  ;;  %v990_v46 = vmul.f32 1.442695, %v960_v38  ;;  %v961_v44 = vsub.f32 %v3059_v3, %v945_v59  ;;  %2255 = vpow2.f32 %v988_v40  ;;  %2025 = vmatpush3.bf16.msra.mxu0 %v2221_v30 }
 0x245   : > { %1008 = vadd.xlane.f32.xlu1 %v3131_v43  ;;  %1010 = vadd.xlane.f32.xlu0 %v3133_v41 }
 0x246   : > { %2257 = vpow2.f32 %v990_v46  ;;  %v992_v62 = vmul.f32 1.442695, %v961_v44  ;;  %v3138_v47 = vpop.eup %2247  ;;  %2026 = vmatprep.subr.bf16.mxu0 %v2222_v36 }
 0x248   : > { %v3140_v49 = vpop.eup %2249  ;;  %2259 = vpow2.f32 %v992_v62  ;;  %2027 = vmatpush3.bf16.msra.mxu0 %v2222_v36 }
 0x249   : > { %1012 = vadd.xlane.f32.xlu1 %v3138_v47  ;;  %1014 = vadd.xlane.f32.xlu0 %v3140_v49 }
 0x24a   : > { %v3144_v63 = vpop.eup %2251  ;;  %2028 = vmatprep.subr.bf16.mxu0 %v2223_v29 }
 0x24c   : > { %v3150_v3 = vpop.eup %2253  ;;  %2029 = vmatpush3.bf16.msra.mxu0 %v2223_v29 }
 0x24d   : > { %1016 = vadd.xlane.f32.xlu1 %v3144_v63  ;;  %1018 = vadd.xlane.f32.xlu0 %v3150_v3 }
 0x24e   : > { %v3154_v50 = vpop.eup %2255 }
 0x250   : > { %v3156_v52 = vpop.eup %2257 }
 0x251   : > { %1020 = vadd.xlane.f32.xlu1 %v3154_v50  ;;  %1022 = vadd.xlane.f32.xlu0 %v3156_v52 }
 0x252   : > { %v3163_v58 = vpop.eup %2259 }
 0x255   : > { %1024 = vadd.xlane.f32.xlu1 %v3163_v58  ;;  %667 = vmax.xlane.f32.xlu0 %v3161_v51 }
 0x259   : > { %669 = vmax.xlane.f32.xlu1 %v3171_v54  ;;  %671 = vmax.xlane.f32.xlu0 %v3166_v34 }
 0x25d   : > { %673 = vmax.xlane.f32.xlu1 %v3174_v60  ;;  %675 = vmax.xlane.f32.xlu0 %v3179_v18 }
 0x261   : > { %677 = vmax.xlane.f32.xlu1 %v3187_v20  ;;  %679 = vmax.xlane.f32.xlu0 %v3182_v7 }
 0x265   : > { %681 = vmax.xlane.f32.xlu1 %v3190_v19  ;;  %683 = vmax.xlane.f32.xlu0 %v3195_v22 }
 0x269   : > { %685 = vmax.xlane.f32.xlu1 %v3203_v24  ;;  %687 = vmax.xlane.f32.xlu0 %v3198_v21 }
 0x26d   : > { %689 = vmax.xlane.f32.xlu1 %v3206_v23  ;;  %691 = vmax.xlane.f32.xlu0 %v3211_v25 }
 0x271   : > { %693 = vmax.xlane.f32.xlu1 %v3219_v28  ;;  %695 = vmax.xlane.f32.xlu0 %v3214_v26 }
 0x275   : > { %697 = vmax.xlane.f32.xlu1 %v3222_v27 }
 0x2c2   : > { %v995_v32 = vpop.xlane.xlu0 %994 }
 0x2c3   : > { %2261 = vrcp.f32 %v995_v32 }
 0x2c6   : > { %v997_v55 = vpop.xlane.xlu1 %996  ;;  %v999_v31 = vpop.xlane.xlu0 %998 }
 0x2c7   : > { %2263 = vrcp.f32 %v997_v55 }
 0x2c8   : > { %2265 = vrcp.f32 %v999_v31 }
 0x2ca   : > { %v1001_v39 = vpop.xlane.xlu1 %1000  ;;  %v1003_v35 = vpop.xlane.xlu0 %1002 }
 0x2cb   : > { %2267 = vrcp.f32 %v1001_v39 }
 0x2cc   : > { %2269 = vrcp.f32 %v1003_v35 }
 0x2cd   : > { %v2262_v38 = vpop.eup %2261 }
 0x2ce   : > { %v1005_v56 = vpop.xlane.xlu1 %1004  ;;  %v1007_v40 = vpop.xlane.xlu0 %1006  ;;  %v1042_v62 = vmul.f32 %v2262_v38, %v3102_v37 }
 0x2cf   : > { %2271 = vrcp.f32 %v1005_v56 }
 0x2d0   : > { %2273 = vrcp.f32 %v1007_v40 }
 0x2d1   : > { %v2264_v59 = vpop.eup %2263 }
 0x2d2   : > { %v1009_v46 = vpop.xlane.xlu1 %1008  ;;  %v1011_v44 = vpop.xlane.xlu0 %1010  ;;  %v1043_v48 = vmul.f32 %v2264_v59, %v3109_v45 }
 0x2d3   : > { %v2266_v30 = vpop.eup %2265  ;;  %2275 = vrcp.f32 %v1009_v46 }
 0x2d4   : > { %v1211_v36 = vpack.c.bf16 %v1043_v48, %v1042_v62  ;;  %2277 = vrcp.f32 %v1011_v44  ;;  %v1044_v32 = vmul.f32 %v2266_v30, %v3107_v42 }
 0x2d5   : > { %v2268_v29 = vpop.eup %2267 }
 0x2d6   : > { %v1045_v55 = vmul.f32 %v2268_v29, %v3115_v53  ;;  %v1013_v31 = vpop.xlane.xlu1 %1012  ;;  %2072 = vmatprep.mubr.bf16.mxu1 %v1211_v36  ;;  %v1015_v39 = vpop.xlane.xlu0 %1014 }
 0x2d7   : > { %v2270_v35 = vpop.eup %2269  ;;  %2279 = vrcp.f32 %v1013_v31 }
 0x2d8   : > { %v1212_v56 = vpack.c.bf16 %v1045_v55, %v1044_v32  ;;  %2281 = vrcp.f32 %v1015_v39  ;;  %v1046_v38 = vmul.f32 %v2270_v35, %v3117_v57 }
 0x2d9   : > { %v2272_v40 = vpop.eup %2271 }
 0x2da   : > { %v1017_v37 = vpop.xlane.xlu1 %1016  ;;  %2073 = vmatmul.mubr.bf16.vlgmr.msra.gmra.mrb[16].mxu1 %v1212_v56  ;;  %v1019_v45 = vpop.xlane.xlu0 %1018  ;;  %v1047_v59 = vmul.f32 %v2272_v40, %v3123_v61 }
 0x2db   : > { %v2274_v46 = vpop.eup %2273  ;;  %2283 = vrcp.f32 %v1017_v37 }
 0x2dc   : > { %v1213_v42 = vpack.c.bf16 %v1047_v59, %v1046_v38  ;;  %2285 = vrcp.f32 %v1019_v45  ;;  %v1048_v48 = vmul.f32 %v2274_v46, %v3125_v33 }
 0x2dd   : > { %v2276_v44 = vpop.eup %2275 }
 0x2de   : > { %v1021_v53 = vpop.xlane.xlu1 %1020  ;;  %2076 = vmatprep.mubr.bf16.mxu1 %v1213_v42  ;;  %v1023_v62 = vpop.xlane.xlu0 %1022  ;;  %v1049_v30 = vmul.f32 %v2276_v44, %v3131_v43 }
 0x2df   : > { %v2278_v36 = vpop.eup %2277  ;;  %2287 = vrcp.f32 %v1021_v53 }
 0x2e0   : > { %v1214_v29 = vpack.c.bf16 %v1049_v30, %v1048_v48  ;;  %2289 = vrcp.f32 %v1023_v62  ;;  %v1050_v55 = vmul.f32 %v2278_v36, %v3133_v41 }
 0x2e1   : > { %v2280_v32 = vpop.eup %2279 }
 0x2e2   : > { %v1025_v57 = vpop.xlane.xlu1 %1024  ;;  %2077 = vmatmul.mubr.bf16.gmra.mrb[20].mxu1 %v1214_v29  ;;  %v668_v61 = vpop.xlane.xlu0 %667  ;;  %v1051_v31 = vmul.f32 %v2280_v32, %v3138_v47 }
 0x2e3   : > { %v2282_v39 = vpop.eup %2281  ;;  %2291 = vrcp.f32 %v1025_v57  ;;  %v699_v35 = vsub.f32 %v3161_v51, %v668_v61 }
 0x2e4   : > { %v1215_v56 = vpack.c.bf16 %v1051_v31, %v1050_v55  ;;  %v1052_v45 = vmul.f32 %v2282_v39, %v3140_v49 }
 0x2e5   : > { %v2284_v33 = vpop.eup %2283  ;;  %v715_v40 = vmul.f32 1.442695, %v699_v35 }
 0x2e6   : > { %2080 = vmatprep.mubr.bf16.mxu1 %v1215_v56  ;;  %v670_v43 = vpop.xlane.xlu1 %669  ;;  %v672_v37 = vpop.xlane.xlu0 %671  ;;  %v1053_v38 = vmul.f32 %v2284_v33, %v3144_v63 }
 0x2e7   : > { %v2286_v59 = vpop.eup %2285  ;;  %2293 = vpow2.f32 %v715_v40  ;;  %v700_v41 = vsub.f32 %v3171_v54, %v670_v43  ;;  %v701_v47 = vsub.f32 %v3166_v34, %v672_v37 }
 0x2e8   : > { %v1216_v46 = vpack.c.bf16 %v1053_v38, %v1052_v45  ;;  %v1054_v48 = vmul.f32 %v2286_v59, %v3150_v3 }
 0x2e9   : > { %v2288_v42 = vpop.eup %2287  ;;  %v717_v44 = vmul.f32 1.442695, %v700_v41  ;;  %v719_v51 = vmul.f32 1.442695, %v701_v47 }
 0x2ea   : > { %2081 = vmatmul.mubr.bf16.gmra.mrb[24].mxu1 %v1216_v46  ;;  %v674_v53 = vpop.xlane.xlu1 %673  ;;  %v676_v62 = vpop.xlane.xlu0 %675  ;;  %v1055_v30 = vmul.f32 %v2288_v42, %v3154_v50 }
 0x2eb   : > { %v2290_v49 = vpop.eup %2289  ;;  %2295 = vpow2.f32 %v717_v44  ;;  %v702_v63 = vsub.f32 %v3174_v60, %v674_v53  ;;  %v703_v36 = vsub.f32 %v3179_v18, %v676_v62 }
 0x2ec   : > { %2297 = vpow2.f32 %v719_v51  ;;  %v1217_v54 = vpack.c.bf16 %v1055_v30, %v1054_v48  ;;  %v1056_v55 = vmul.f32 %v2290_v49, %v3156_v52 }
 0x2ed   : > { %v2292_v34 = vpop.eup %2291  ;;  %v721_v29 = vmul.f32 1.442695, %v702_v63  ;;  %v723_v32 = vmul.f32 1.442695, %v703_v36 }
 0x2ee   : > { %2084 = vmatprep.mubr.bf16.mxu1 %v1217_v54  ;;  %v678_v57 = vpop.xlane.xlu1 %677  ;;  %v680_v61 = vpop.xlane.xlu0 %679  ;;  %v1057_v3 = vmul.f32 %v2292_v34, %v3163_v58 }
 0x2ef   : > { %2299 = vpow2.f32 %v721_v29  ;;  %v704_v50 = vsub.f32 %v3187_v20, %v678_v57  ;;  %v705_v31 = vsub.f32 %v3182_v7, %v680_v61  ;;  %v2225_v61 = vld [vmem:[%s2876_s24 + $0x20] sm:$0xff]  }
 0x2f0   : > { %2301 = vpow2.f32 %v723_v32  ;;  %v1218_v60 = vpack.c.bf16 %v1057_v3, %v1056_v55  ;;  %v2226_v3 = vld [vmem:[%s2876_s24 + $0x28] sm:$0xff]  }
 0x2f1   : > { %v3253_v18 = vpop.eup %2293  ;;  %v725_v39 = vmul.f32 1.442695, %v704_v50  ;;  %v727_v35 = vmul.f32 1.442695, %v705_v31 }
 0x2f2   : > { %2085 = vmatmul.mubr.bf16.gmra.mrb[28].mxu1 %v1218_v60  ;;  %v682_v56 = vpop.xlane.xlu1 %681  ;;  %747 = vadd.xlane.f32.xlu0 %v3253_v18  ;;  %v684_v33 = vpop.xlane.xlu0 %683  ;;  %v2227_v60 = vld [vmem:[%s2876_s24 + $0x30] sm:$0xff]  }
 0x2f3   : > { %2303 = vpow2.f32 %v725_v39  ;;  %v706_v52 = vsub.f32 %v3190_v19, %v682_v56  ;;  %v707_v58 = vsub.f32 %v3195_v22, %v684_v33 }
 0x2f4   : > { %2305 = vpow2.f32 %v727_v35  ;;  %v2228_v35 = vld [vmem:[%s2876_s24 + $0x38] sm:$0xff]  }
 0x2f5   : > { %v3258_v20 = vpop.eup %2295  ;;  %v729_v7 = vmul.f32 1.442695, %v706_v52  ;;  %v731_v40 = vmul.f32 1.442695, %v707_v58 }
 0x2f6   : > { %v3260_v43 = vpop.eup %2297  ;;  %749 = vadd.xlane.f32.xlu1 %v3258_v20  ;;  %v686_v37 = vpop.xlane.xlu1 %685 }
 0x2f7   : > { %v688_v45 = vpop.xlane.xlu0 %687  ;;  %2307 = vpow2.f32 %v729_v7  ;;  %v708_v38 = vsub.f32 %v3203_v24, %v686_v37  ;;  %751 = vadd.xlane.f32.xlu0 %v3260_v43 }
 0x2f8   : > { %v709_v19 = vsub.f32 %v3198_v21, %v688_v45  ;;  %2309 = vpow2.f32 %v731_v40 }
 0x2f9   : > { %v3266_v22 = vpop.eup %2299  ;;  %v733_v59 = vmul.f32 1.442695, %v708_v38 }
 0x2fa   : > { %v735_v41 = vmul.f32 1.442695, %v709_v19  ;;  %v3268_v47 = vpop.eup %2301  ;;  %753 = vadd.xlane.f32.xlu1 %v3266_v22  ;;  %v690_v46 = vpop.xlane.xlu1 %689 }
 0x2fb   : > { %v692_v42 = vpop.xlane.xlu0 %691  ;;  %2311 = vpow2.f32 %v733_v59  ;;  %v710_v44 = vsub.f32 %v3206_v23, %v690_v46  ;;  %755 = vadd.xlane.f32.xlu0 %v3268_v47 }
 0x2fc   : > { %v711_v24 = vsub.f32 %v3211_v25, %v692_v42  ;;  %2313 = vpow2.f32 %v735_v41  ;;  %v2224_v25 = vld [vmem:[%s2876_s24 + $0x18] sm:$0xff]   ;;  %s2447_s24 = scalar_lea.vmem %s3365_s29, 2048 }
 0x2fd   : > { %v3274_v21 = vpop.eup %2303  ;;  %v737_v51 = vmul.f32 1.442695, %v710_v44  ;;  %2030 = vmatprep.subr.bf16.mxu0 %v2224_v25  ;;  %p2448_p5 = scmp.ne.s32.totalorder %s3365_s29, %s2447_s24  ;;  %p2455_p8 = scmp.lt.s32.totalorder %s2453_s21, %s2447_s24 }
 0x2fe   : > { %v739_v53 = vmul.f32 1.442695, %v711_v24  ;;  %v3276_v62 = vpop.eup %2305  ;;  %757 = vadd.xlane.f32.xlu1 %v3274_v21  ;;  %v694_v48 = vpop.xlane.xlu1 %693  ;;  %2031 = vmatpush3.bf16.msra.mxu0 %v2224_v25 }
 0x2ff   : > { %v696_v30 = vpop.xlane.xlu0 %695  ;;  %2315 = vpow2.f32 %v737_v51  ;;  %v712_v49 = vsub.f32 %v3219_v28, %v694_v48  ;;  %759 = vadd.xlane.f32.xlu0 %v3276_v62  ;;  %2032 = vmatprep.subr.bf16.mxu0 %v2225_v61  ;;  %p2449_p9 = pnand %p2448_p5, %p3651_p6  ;;  %p2456_p10 = por %p2455_p8, %p2454_p3 }
 0x300   : > { %v713_v23 = vsub.f32 %v3214_v26, %v696_v30  ;;  %2317 = vpow2.f32 %v739_v53 }
 0x301   : > { %v3283_v63 = vpop.eup %2307  ;;  %v741_v36 = vmul.f32 1.442695, %v712_v49  ;;  %p2450_p12 = pneg %p2449_p9 }
 0x302   : > { %v743_v54 = vmul.f32 1.442695, %v713_v23  ;;  %v3285_v34 = vpop.eup %2309  ;;  %761 = vadd.xlane.f32.xlu1 %v3283_v63  ;;  %v698_v29 = vpop.xlane.xlu1 %697  ;;  %2033 = vmatpush3.bf16.msra.mxu0 %v2225_v61 }
 0x303   : > { %2319 = vpow2.f32 %v741_v36  ;;  %v714_v28 = vsub.f32 %v3222_v27, %v698_v29  ;;  %763 = vadd.xlane.f32.xlu0 %v3285_v34  ;;  %2034 = vmatprep.subr.bf16.mxu0 %v2226_v3  ;;  %p2457_p7 = pnand %p2456_p10, %p2450_p12 }
 0x304   : > { %2321 = vpow2.f32 %v743_v54 }
 0x305   : > { %v3290_v26 = vpop.eup %2311  ;;  %v745_v32 = vmul.f32 1.442695, %v714_v28 }
 0x306   : > { %v3292_v57 = vpop.eup %2313  ;;  %765 = vadd.xlane.f32.xlu1 %v3290_v26  ;;  %2035 = vmatpush3.bf16.msra.mxu0 %v2226_v3 }
 0x307   : > { %2323 = vpow2.f32 %v745_v32  ;;  %767 = vadd.xlane.f32.xlu0 %v3292_v57  ;;  %2036 = vmatprep.subr.bf16.mxu0 %v2227_v60 }
 0x309   : > { %v3297_v55 = vpop.eup %2315 }
 0x30a   : > { %v3299_v27 = vpop.eup %2317  ;;  %769 = vadd.xlane.f32.xlu1 %v3297_v55  ;;  %2037 = vmatpush3.bf16.msra.mxu0 %v2227_v60 }
 0x30b   : > { %771 = vadd.xlane.f32.xlu0 %v3299_v27  ;;  %2038 = vmatprep.subr.bf16.mxu0 %v2228_v35 }
 0x30d   : > { %v3304_v50 = vpop.eup %2319 }
 0x30e   : > { %v3306_v31 = vpop.eup %2321  ;;  %773 = vadd.xlane.f32.xlu1 %v3304_v50  ;;  %2039 = vmatpush3.bf16.msra.mxu0 %v2228_v35 }
 0x30f   : > { %775 = vadd.xlane.f32.xlu0 %v3306_v31 }
 0x311   : > { %v3311_v39 = vpop.eup %2323 }
 0x312   : > { %777 = vadd.xlane.f32.xlu1 %v3311_v39 }
 0x37f   : > { %v748_v56 = vpop.xlane.xlu0 %747 }
 0x380   : > { %2325 = vrcp.f32 %v748_v56 }
 0x383   : > { %v750_v33 = vpop.xlane.xlu1 %749 }
 0x384   : > { %2327 = vrcp.f32 %v750_v33  ;;  %v752_v52 = vpop.xlane.xlu0 %751 }
 0x385   : > { %2329 = vrcp.f32 %v752_v52 }
 0x387   : > { %v754_v58 = vpop.xlane.xlu1 %753 }
 0x388   : > { %2331 = vrcp.f32 %v754_v58  ;;  %v756_v7 = vpop.xlane.xlu0 %755 }
 0x389   : > { %2333 = vrcp.f32 %v756_v7 }
 0x38a   : > { %v2326_v37 = vpop.eup %2325 }
 0x38b   : > { %v758_v40 = vpop.xlane.xlu1 %757  ;;  %v795_v59 = vmul.f32 %v2326_v37, %v3253_v18 }
 0x38c   : > { %2335 = vrcp.f32 %v758_v40  ;;  %v760_v45 = vpop.xlane.xlu0 %759 }
 0x38d   : > { %2337 = vrcp.f32 %v760_v45 }
 0x38e   : > { %v2328_v38 = vpop.eup %2327 }
 0x38f   : > { %v762_v19 = vpop.xlane.xlu1 %761  ;;  %v796_v41 = vmul.f32 %v2328_v38, %v3258_v20  ;;  %v2330_v46 = vpop.eup %2329 }
 0x390   : > { %2339 = vrcp.f32 %v762_v19  ;;  %v764_v42 = vpop.xlane.xlu0 %763  ;;  %v797_v51 = vmul.f32 %v2330_v46, %v3260_v43 }
 0x391   : > { %v3317_v44 = vpack.c.bf16 %v796_v41, %v795_v59  ;;  %2341 = vrcp.f32 %v764_v42 }
 0x392   : > { %v2332_v24 = vpop.eup %2331 }
 0x393   : > { %v798_v53 = vmul.f32 %v2332_v24, %v3266_v22  ;;  %v766_v48 = vpop.xlane.xlu1 %765  ;;  %2040 = vmatprep.mubr.bf16.mxu0 %v3317_v44  ;;  %v2334_v30 = vpop.eup %2333 }
 0x394   : > { %2343 = vrcp.f32 %v766_v48  ;;  %v768_v49 = vpop.xlane.xlu0 %767  ;;  %v799_v25 = vmul.f32 %v2334_v30, %v3268_v47 }
 0x395   : > { %v3322_v18 = vpack.c.bf16 %v798_v53, %v797_v51  ;;  %2345 = vrcp.f32 %v768_v49 }
 0x396   : > { %v2336_v20 = vpop.eup %2335 }
 0x397   : > { %v770_v23 = vpop.xlane.xlu1 %769  ;;  %2041 = vmatmul.mubr.bf16.vlgmr.msra.gmra.mrb[16].mxu0 %v3322_v18  ;;  %v800_v36 = vmul.f32 %v2336_v20, %v3274_v21  ;;  %v2338_v43 = vpop.eup %2337 }
 0x398   : > { %2347 = vrcp.f32 %v770_v23  ;;  %v772_v22 = vpop.xlane.xlu0 %771  ;;  %v801_v32 = vmul.f32 %v2338_v43, %v3276_v62 }
 0x399   : > { %v3327_v54 = vpack.c.bf16 %v800_v36, %v799_v25  ;;  %2349 = vrcp.f32 %v772_v22 }
 0x39a   : > { %v2340_v29 = vpop.eup %2339 }
 0x39b   : > { %v774_v28 = vpop.xlane.xlu1 %773  ;;  %2044 = vmatprep.mubr.bf16.mxu0 %v3327_v54  ;;  %v802_v61 = vmul.f32 %v2340_v29, %v3283_v63  ;;  %v2342_v3 = vpop.eup %2341 }
 0x39c   : > { %2351 = vrcp.f32 %v774_v28  ;;  %v776_v60 = vpop.xlane.xlu0 %775  ;;  %v803_v56 = vmul.f32 %v2342_v3, %v3285_v34 }
 0x39d   : > { %v3332_v47 = vpack.c.bf16 %v802_v61, %v801_v32  ;;  %2353 = vrcp.f32 %v776_v60 }
 0x39e   : > { %v2344_v21 = vpop.eup %2343 }
 0x39f   : > { %v778_v35 = vpop.xlane.xlu1 %777  ;;  %2045 = vmatmul.mubr.bf16.gmra.mrb[20].mxu0 %v3332_v47  ;;  %v804_v33 = vmul.f32 %v2344_v21, %v3290_v26  ;;  %v2346_v52 = vpop.eup %2345 }
 0x3a0   : > { %2355 = vrcp.f32 %v778_v35  ;;  %v805_v63 = vmul.f32 %v2346_v52, %v3292_v57 }
 0x3a1   : > { %v1062_v58 = vpack.c.bf16 %v804_v33, %v803_v56 }
 0x3a2   : > { %v2348_v62 = vpop.eup %2347 }
 0x3a3   : > { %2048 = vmatprep.mubr.bf16.mxu0 %v1062_v58  ;;  %2112 = vmatprep.mubr.bf16.mxu1 %v1062_v58  ;;  %v806_v7 = vmul.f32 %v2348_v62, %v3297_v55  ;;  %v2350_v40 = vpop.eup %2349 }
 0x3a4   : > { %v807_v34 = vmul.f32 %v2350_v40, %v3299_v27 }
 0x3a5   : > { %v3339_v37 = vpack.c.bf16 %v806_v7, %v805_v63 }
 0x3a6   : > { %v2352_v45 = vpop.eup %2351 }
 0x3a7   : > { %2049 = vmatmul.mubr.bf16.gmra.mrb[24].mxu0 %v3339_v37  ;;  %v808_v26 = vmul.f32 %v2352_v45, %v3304_v50  ;;  %v2354_v38 = vpop.eup %2353 }
 0x3a8   : > { %v809_v57 = vmul.f32 %v2354_v38, %v3306_v31 }
 0x3a9   : > { %v3344_v19 = vpack.c.bf16 %v808_v26, %v807_v34 }
 0x3aa   : > { %v2356_v59 = vpop.eup %2355 }
 0x3ab   : > { %2052 = vmatprep.mubr.bf16.mxu0 %v3344_v19  ;;  %v810_v55 = vmul.f32 %v2356_v59, %v3311_v39 }
 0x3ad   : > { %v2074_v41 = vpop.f32.mrb[16].mxu1  ;;  %v1065_v46 = vpack.c.bf16 %v810_v55, %v809_v57 }
 0x3ae   : > { %v1253_v42 = vpop.f32.mrb[17].mxu1 }
 0x3af   : > { %2053 = vmatmul.mubr.bf16.gmra.mrb[28].mxu0 %v1065_v46  ;;  %v2075_v24 = vpop.f32.mrb[18].mxu1 }
 0x3b0   : > { %v1317_v51 = vpack.c.bf16 %v2075_v24, %v2074_v41  ;;  %v1256_v53 = vpop.f32.mrb[19].mxu1  ;;  %2104 = vmatprep.mubr.bf16.mxu0 %v3317_v44 }
 0x3b1   : > { %v1316_v27 = vpack.c.bf16 %v1256_v53, %v1253_v42 }
 0x3b3   : > { %2088 = vmatprep.subr.bf16.mxu0 %v1316_v27  ;;  %2120 = vmatprep.subr.bf16.mxu1 %v1316_v27 }
 0x3b4   : > { %2089 = vmatpush3.bf16.msra.mxu0 %v1316_v27  ;;  %2128 = vmatpush3.bf16.msra.mxu1 %v1316_v27 }
 0x3b5   : > { %v2078_v50 = vpop.f32.mrb[20].mxu1  ;;  %2090 = vmatprep.subr.bf16.mxu0 %v1317_v51  ;;  %2121 = vmatprep.subr.bf16.mxu1 %v1317_v51 }
 0x3b6   : > { %v1269_v31 = vpop.f32.mrb[21].mxu1 }
 0x3b7   : > { %v2079_v48 = vpop.f32.mrb[22].mxu1 }
 0x3b8   : > { %v1319_v39 = vpack.c.bf16 %v2079_v48, %v2078_v50  ;;  %v1272_v30 = vpop.f32.mrb[23].mxu1  ;;  %2091 = vmatpush3.bf16.msra.mxu0 %v1317_v51  ;;  %2129 = vmatpush3.bf16.msra.mxu1 %v1317_v51 }
 0x3b9   : > { %v1318_v49 = vpack.c.bf16 %v1272_v30, %v1269_v31 }
 0x3bb   : > { %2092 = vmatprep.subr.bf16.mxu0 %v1318_v49  ;;  %2122 = vmatprep.subr.bf16.mxu1 %v1318_v49 }
 0x3bc   : > { %2093 = vmatpush3.bf16.msra.mxu0 %v1318_v49  ;;  %2130 = vmatpush3.bf16.msra.mxu1 %v1318_v49 }
 0x3bd   : > { %v2082_v44 = vpop.f32.mrb[24].mxu1  ;;  %2094 = vmatprep.subr.bf16.mxu0 %v1319_v39  ;;  %2123 = vmatprep.subr.bf16.mxu1 %v1319_v39 }
 0x3be   : > { %v1285_v20 = vpop.f32.mrb[25].mxu1 }
 0x3bf   : > { %v2083_v23 = vpop.f32.mrb[26].mxu1 }
 0x3c0   : > { %v1321_v25 = vpack.c.bf16 %v2083_v23, %v2082_v44  ;;  %v1288_v36 = vpop.f32.mrb[27].mxu1  ;;  %2095 = vmatpush3.bf16.msra.mxu0 %v1319_v39  ;;  %2131 = vmatpush3.bf16.msra.mxu1 %v1319_v39 }
 0x3c1   : > { %v1320_v43 = vpack.c.bf16 %v1288_v36, %v1285_v20 }
 0x3c3   : > { %2096 = vmatprep.subr.bf16.mxu0 %v1320_v43  ;;  %2124 = vmatprep.subr.bf16.mxu1 %v1320_v43 }
 0x3c4   : > { %2097 = vmatpush3.bf16.msra.mxu0 %v1320_v43  ;;  %2132 = vmatpush3.bf16.msra.mxu1 %v1320_v43 }
 0x3c5   : > { %v2086_v22 = vpop.f32.mrb[28].mxu1  ;;  %2098 = vmatprep.subr.bf16.mxu0 %v1321_v25  ;;  %2125 = vmatprep.subr.bf16.mxu1 %v1321_v25 }
 0x3c6   : > { %v1301_v29 = vpop.f32.mrb[29].mxu1 }
 0x3c7   : > { %v2087_v28 = vpop.f32.mrb[30].mxu1 }
 0x3c8   : > { %v1323_v32 = vpack.c.bf16 %v2087_v28, %v2086_v22  ;;  %v1304_v61 = vpop.f32.mrb[31].mxu1  ;;  %2099 = vmatpush3.bf16.msra.mxu0 %v1321_v25  ;;  %2133 = vmatpush3.bf16.msra.mxu1 %v1321_v25 }
 0x3c9   : > { %v1322_v3 = vpack.c.bf16 %v1304_v61, %v1301_v29 }
 0x3cb   : > { %2100 = vmatprep.subr.bf16.mxu0 %v1322_v3  ;;  %2126 = vmatprep.subr.bf16.mxu1 %v1322_v3 }
 0x3cc   : > { %2101 = vmatpush3.bf16.msra.mxu0 %v1322_v3  ;;  %2134 = vmatpush3.bf16.msra.mxu1 %v1322_v3 }
 0x3cd   : > { %2102 = vmatprep.subr.bf16.mxu0 %v1323_v32  ;;  %2127 = vmatprep.subr.bf16.mxu1 %v1323_v32 }
 0x3d0   : > { %2103 = vmatpush3.bf16.msra.mxu0 %v1323_v32  ;;  %2135 = vmatpush3.bf16.msra.mxu1 %v1323_v32 }
 0x3d3   : > { %2105 = vmatmul.mubr.bf16.vlgmr.msra.gmra.mrb[32].mxu0 %v3322_v18  ;;  %2113 = vmatmul.mubr.bf16.vlgmr.msra.gmra.mrb[32].mxu1 %v3339_v37 }
 0x3d4   : > { %2108 = vmatprep.mubr.bf16.mxu0 %v3327_v54  ;;  %2116 = vmatprep.mubr.bf16.mxu1 %v3344_v19 }
 0x3db   : > { %2109 = vmatmul.mubr.bf16.gmra.mrb[36].mxu0 %v3332_v47  ;;  %2117 = vmatmul.mubr.bf16.gmra.mrb[36].mxu1 %v1065_v46 }
 0x3dc   : > { %2460 = shalt.err (!%p2457_p7)
}
 0x3dd   : > { %s2461_s15 = scalar_lea.hbm %s3362_s12, 2048  ;;  %s2465_s20 = scalar_lea.hbm %s3616_s5, 4096 }
 0x3de   : > { %p2462_p11 = scmp.ne.s32.totalorder %s3362_s12, %s2461_s15  ;;  %p2466_p1 = scmp.lt.u32.totalorder %s3362_s12, %s3616_s5 }
 0x3df   : > { %p2467_p0 = scmp.lt.u32.totalorder %s2465_s20, %s2461_s15  ;;  %p2469_p5 = scmp.lt.u32.totalorder %s2461_s15, %s3362_s12 }
 0x3e0   : > { %p2463_p2 = pnand %p2462_p11, %p3651_p6 }
 0x3e1   : > { %p2468_p13 = por %p2467_p0, %p2466_p1 }
 0x3e2   : > { %p2464_p4 = pneg %p2463_p2 }
 0x3e3   : > { %p2470_p9 = por %p2469_p5, %p2468_p13 }
 0x3e5   : > { %p2471_p12 = pnand %p2470_p9, %p2464_p4 }
 0x3e7   : > { %2474 = shalt.err (!%p2471_p12)
}
 0x3e8   : > { %s2619_s25 = smov 128   ;;  %s2620_s19 = smov 8  }
 0x3e9   : > { %2142 = dma.vmem_to_hbm [thread:$0]  (%p3651_p6), %s3365_s29, 2048, %s3362_s12, %s1518_s13, %s2619_s25, %s2619_s25, %s2620_s19  }
 0x3ea   : > { %s3395_s24 = scalar_lea.vmem [#allocation9], %s2860_s17  ;;  %s3402_s11 = scalar_lea.vmem [#allocation11], %s2860_s17 }
 0x3eb   : > { %s1562_s12 = sshll.u32 %s3395_s24, 4  ;;  %s1578_s29 = sshll.u32 %s3402_s11, 4  ;;  %s3448_s12 = int_to_ptr.vmem [resolvable:$true] %s1562_s12  ;;  %s3462_s29 = int_to_ptr.vmem [resolvable:$true] %s1578_s29 }
 0x3ec   : > { %s3446_s21 = scalar_lea.hbm %s3617_s6, %s3356_s22  ;;  %s3460_s18 = scalar_lea.hbm %s3618_s7, %s3356_s22 }
 0x3ed   : > { %s3467_s20 = scalar_lea.sflag [#allocation10], %s374_s27  ;;  %s2475_s26 = scalar_lea.vmem %s3448_s12, 2048 }
 0x3ee   : > { %p2476_p3 = scmp.ne.s32.totalorder %s3448_s12, %s2475_s26  ;;  %s2621_s23 = smov [#allocation9]  }
 0x3f0   : > { %p2477_p8 = pnand %p2476_p3, %p3651_p6 }
 0x3f2   : > { %p2478_p10 = pneg %p2477_p8 }
 0x46a   : > { %v2042_v18 = vpop.f32.mrb[16].mxu0 }
 0x46b   : > { %1439 = vst [vmem:[%s3395_s24 + $0x10] sm:$0xff] %v2042_v18  ;;  %v1455_v54 = vmul.f32 %v2042_v18, %v2889_v2  ;;  %v1148_v60 = vpop.f32.mrb[17].mxu0 }
 0x46c   : > { %1437 = vst [vmem:[%s3395_s24] sm:$0xff] %v1148_v60  ;;  %v1453_v47 = vmul.f32 %v1148_v60, %v2883_v0  ;;  %v2043_v21 = vpop.f32.mrb[18].mxu0 }
 0x46d   : > { %1471 = vst [vmem:[%s3402_s11 + $0x10] sm:$0xff] %v1455_v54  ;;  %1440 = vst [vmem:[%s3395_s24 + $0x18] sm:$0xff] %v2043_v21  ;;  %v1456_v35 = vmul.f32 %v2043_v21, %v2903_v4  ;;  %v1151_v56 = vpop.f32.mrb[19].mxu0 }
 0x46e   : > { %1469 = vst [vmem:[%s3402_s11] sm:$0xff] %v1453_v47  ;;  %1438 = vst [vmem:[%s3395_s24 + $0x8] sm:$0xff] %v1151_v56  ;;  %v1454_v33 = vmul.f32 %v1151_v56, %v2886_v1 }
 0x46f   : > { %1472 = vst [vmem:[%s3402_s11 + $0x18] sm:$0xff] %v1456_v35 }
 0x470   : > { %1470 = vst [vmem:[%s3402_s11 + $0x8] sm:$0xff] %v1454_v33 }
 0x472   : > { %v2046_v52 = vpop.f32.mrb[20].mxu0 }
 0x473   : > { %1443 = vst [vmem:[%s3395_s24 + $0x30] sm:$0xff] %v2046_v52  ;;  %v1459_v58 = vmul.f32 %v2046_v52, %v2924_v8  ;;  %v1164_v62 = vpop.f32.mrb[21].mxu0 }
 0x474   : > { %1441 = vst [vmem:[%s3395_s24 + $0x20] sm:$0xff] %v1164_v62  ;;  %v1457_v63 = vmul.f32 %v1164_v62, %v2908_v5  ;;  %v2047_v7 = vpop.f32.mrb[22].mxu0 }
 0x475   : > { %1475 = vst [vmem:[%s3402_s11 + $0x30] sm:$0xff] %v1459_v58  ;;  %1444 = vst [vmem:[%s3395_s24 + $0x38] sm:$0xff] %v2047_v7  ;;  %v1460_v40 = vmul.f32 %v2047_v7, %v2927_v9  ;;  %v1167_v37 = vpop.f32.mrb[23].mxu0 }
 0x476   : > { %1473 = vst [vmem:[%s3402_s11 + $0x20] sm:$0xff] %v1457_v63  ;;  %1442 = vst [vmem:[%s3395_s24 + $0x28] sm:$0xff] %v1167_v37  ;;  %v1458_v45 = vmul.f32 %v1167_v37, %v2911_v6 }
 0x477   : > { %1476 = vst [vmem:[%s3402_s11 + $0x38] sm:$0xff] %v1460_v40 }
 0x478   : > { %1474 = vst [vmem:[%s3402_s11 + $0x28] sm:$0xff] %v1458_v45 }
 0x47a   : > { %v2050_v34 = vpop.f32.mrb[24].mxu0 }
 0x47b   : > { %1447 = vst [vmem:[%s3395_s24 + $0x50] sm:$0xff] %v2050_v34  ;;  %v1463_v26 = vmul.f32 %v2050_v34, %v2943_v12  ;;  %v1180_v38 = vpop.f32.mrb[25].mxu0 }
 0x47c   : > { %1445 = vst [vmem:[%s3395_s24 + $0x40] sm:$0xff] %v1180_v38  ;;  %v1461_v19 = vmul.f32 %v1180_v38, %v2930_v10  ;;  %v2051_v59 = vpop.f32.mrb[26].mxu0 }
 0x47d   : > { %1479 = vst [vmem:[%s3402_s11 + $0x50] sm:$0xff] %v1463_v26  ;;  %1448 = vst [vmem:[%s3395_s24 + $0x58] sm:$0xff] %v2051_v59  ;;  %v1464_v57 = vmul.f32 %v2051_v59, %v2946_v13  ;;  %v1183_v55 = vpop.f32.mrb[27].mxu0 }
 0x47e   : > { %1477 = vst [vmem:[%s3402_s11 + $0x40] sm:$0xff] %v1461_v19  ;;  %1446 = vst [vmem:[%s3395_s24 + $0x48] sm:$0xff] %v1183_v55  ;;  %v1462_v41 = vmul.f32 %v1183_v55, %v2938_v11 }
 0x47f   : > { %1480 = vst [vmem:[%s3402_s11 + $0x58] sm:$0xff] %v1464_v57 }
 0x480   : > { %1478 = vst [vmem:[%s3402_s11 + $0x48] sm:$0xff] %v1462_v41 }
 0x482   : > { %v2054_v46 = vpop.f32.mrb[28].mxu0 }
 0x483   : > { %1451 = vst [vmem:[%s3395_s24 + $0x70] sm:$0xff] %v2054_v46  ;;  %v1467_v42 = vmul.f32 %v2054_v46, %v2963_v16  ;;  %v1196_v24 = vpop.f32.mrb[29].mxu0 }
 0x484   : > { %1449 = vst [vmem:[%s3395_s24 + $0x60] sm:$0xff] %v1196_v24  ;;  %v1465_v51 = vmul.f32 %v1196_v24, %v2957_v14  ;;  %v2055_v53 = vpop.f32.mrb[30].mxu0 }
 0x485   : > { %1483 = vst [vmem:[%s3402_s11 + $0x70] sm:$0xff] %v1467_v42  ;;  %1452 = vst [vmem:[%s3395_s24 + $0x78] sm:$0xff] %v2055_v53  ;;  %v1468_v27 = vmul.f32 %v2055_v53, %v2971_v17  ;;  %v1199_v50 = vpop.f32.mrb[31].mxu0 }
 0x486   : > { %1481 = vst [vmem:[%s3402_s11 + $0x60] sm:$0xff] %v1465_v51  ;;  %1450 = vst [vmem:[%s3395_s24 + $0x68] sm:$0xff] %v1199_v50  ;;  %v1466_v31 = vmul.f32 %v1199_v50, %v2960_v15  ;;  %s2479_s24 = sshll.u32 %s2621_s23, 4  ;;  %s2480_s24 = int_to_ptr.vmem [resolvable:$false] %s2479_s24 }
 0x487   : > { %1484 = vst [vmem:[%s3402_s11 + $0x78] sm:$0xff] %v1468_v27  ;;  %s2481_s13 = scalar_lea.vmem %s2480_s24, 4096  ;;  %p2482_p7 = scmp.lt.s32.totalorder %s3448_s12, %s2480_s24 }
 0x488   : > { %p2483_p11 = scmp.lt.s32.totalorder %s2481_s13, %s2475_s26 }
 0x48a   : > { %p2484_p2 = por %p2483_p11, %p2482_p7 }
 0x48c   : > { %p2485_p4 = pnand %p2484_p2, %p2478_p10 }
 0x48e   : > { %2488 = shalt.err (!%p2485_p4)
}
 0x48f   : > { %s2489_s9 = scalar_lea.hbm %s3446_s21, 2048  ;;  %s2493_s15 = scalar_lea.hbm %s3617_s6, 4096 }
 0x490   : > { %p2490_p1 = scmp.ne.s32.totalorder %s3446_s21, %s2489_s9  ;;  %p2494_p5 = scmp.lt.u32.totalorder %s3446_s21, %s3617_s6 }
 0x491   : > { %p2495_p9 = scmp.lt.u32.totalorder %s2493_s15, %s2489_s9  ;;  %p2497_p3 = scmp.lt.u32.totalorder %s2489_s9, %s3446_s21 }
 0x492   : > { %p2491_p0 = pnand %p2490_p1, %p3651_p6 }
 0x493   : > { %p2496_p12 = por %p2495_p9, %p2494_p5 }
 0x494   : > { %p2492_p13 = pneg %p2491_p0 }
 0x495   : > { %p2498_p8 = por %p2497_p3, %p2496_p12 }
 0x497   : > { %p2499_p10 = pnand %p2498_p8, %p2492_p13 }
 0x499   : > { %2502 = shalt.err (!%p2499_p10)
}
 0x49a   : > { %2143 = dma.vmem_to_hbm [thread:$0]  (%p3651_p6), %s3448_s12, 2048, %s3446_s21, %s3467_s20, %s2619_s25, %s2619_s25, %s2620_s19  }
 0x49b   : > { %1482 = vst [vmem:[%s3402_s11 + $0x68] sm:$0xff] %v1466_v31  ;;  %s2503_s26 = scalar_lea.vmem %s3462_s29, 2048  ;;  %s2622_s24 = smov [#allocation11]  }
 0x49c   : > { %p2504_p7 = scmp.ne.s32.totalorder %s3462_s29, %s2503_s26  ;;  %s2507_s13 = sshll.u32 %s2622_s24, 4  ;;  %s2508_s13 = int_to_ptr.vmem [resolvable:$false] %s2507_s13 }
 0x49d   : > { %s2509_s9 = scalar_lea.vmem %s2508_s13, 4096  ;;  %p2510_p4 = scmp.lt.s32.totalorder %s3462_s29, %s2508_s13 }
 0x49e   : > { %p2505_p11 = pnand %p2504_p7, %p3651_p6  ;;  %p2511_p1 = scmp.lt.s32.totalorder %s2509_s9, %s2503_s26 }
 0x4a0   : > { %p2506_p2 = pneg %p2505_p11  ;;  %p2512_p0 = por %p2511_p1, %p2510_p4 }
 0x4a2   : > { %p2513_p13 = pnand %p2512_p0, %p2506_p2 }
 0x4a4   : > { %2516 = shalt.err (!%p2513_p13)
}
 0x4a5   : > { %s2517_s11 = scalar_lea.hbm %s3460_s18, 2048  ;;  %s2521_s27 = scalar_lea.hbm %s3618_s7, 4096 }
 0x4a6   : > { %p2518_p5 = scmp.ne.s32.totalorder %s3460_s18, %s2517_s11  ;;  %p2522_p3 = scmp.lt.u32.totalorder %s3460_s18, %s3618_s7 }
 0x4a7   : > { %p2523_p8 = scmp.lt.u32.totalorder %s2521_s27, %s2517_s11  ;;  %p2525_p7 = scmp.lt.u32.totalorder %s2517_s11, %s3460_s18 }
 0x4a8   : > { %p2519_p9 = pnand %p2518_p5, %p3651_p6 }
 0x4a9   : > { %p2524_p10 = por %p2523_p8, %p2522_p3 }
 0x4aa   : > { %p2520_p12 = pneg %p2519_p9 }
 0x4ab   : > { %p2526_p11 = por %p2525_p7, %p2524_p10 }
 0x4ad   : > { %p2527_p2 = pnand %p2526_p11, %p2520_p12 }
 0x4af   : > { %2530 = shalt.err (!%p2527_p2)
}
 0x4b0   : > { %2144 = dma.vmem_to_hbm [thread:$0]  (%p3651_p6), %s3462_s29, 2048, %s3460_s18, %s3467_s20, %s2619_s25, %s2619_s25, %s2620_s19   ;;  %v2106_v48 = vpop.f32.mrb[32].mxu0  ;;  %v2114_v39 = vpop.f32.mrb[32].mxu1 }
 0x4b1   : > { %v1487_v30 = vmul.f32 %v2106_v48, %v2889_v2  ;;  %v1495_v49 = vmul.f32 %v2114_v39, %v2943_v12  ;;  %v1358_v44 = vpop.f32.mrb[33].mxu0  ;;  %v1390_v20 = vpop.f32.mrb[33].mxu1  ;;  %s3525_s1 = scalar_lea.vmem [#allocation12], %s2860_s17  ;;  %s3556_s20 = scalar_lea.hbm %s3619_s8, %s3356_s22 }
 0x4b2   : > { %v1485_v23 = vmul.f32 %v1358_v44, %v2883_v0  ;;  %v1493_v25 = vmul.f32 %v1390_v20, %v2930_v10  ;;  %v2107_v36 = vpop.f32.mrb[34].mxu0  ;;  %v2115_v43 = vpop.f32.mrb[34].mxu1  ;;  %s1594_s17 = sshll.u32 %s3525_s1, 4  ;;  %s1533_s23 = scalar_lea.sflag [#allocation13], %s2857_s14  ;;  %s3558_s17 = int_to_ptr.vmem [resolvable:$true] %s1594_s17 }
 0x4b3   : > { %1503 = vst [vmem:[%s3525_s1 + $0x10] sm:$0xff] %v1487_v30  ;;  %1511 = vst [vmem:[%s3525_s1 + $0x50] sm:$0xff] %v1495_v49  ;;  %v1488_v2 = vmul.f32 %v2107_v36, %v2903_v4  ;;  %v1496_v0 = vmul.f32 %v2115_v43, %v2946_v13  ;;  %v1361_v12 = vpop.f32.mrb[35].mxu0  ;;  %v1393_v10 = vpop.f32.mrb[35].mxu1  ;;  %s2531_s26 = scalar_lea.vmem %s3558_s17, 2048  ;;  %s2623_s24 = smov [#allocation12]  }
 0x4b4   : > { %1501 = vst [vmem:[%s3525_s1] sm:$0xff] %v1485_v23  ;;  %1509 = vst [vmem:[%s3525_s1 + $0x40] sm:$0xff] %v1493_v25  ;;  %v1486_v22 = vmul.f32 %v1361_v12, %v2886_v1  ;;  %v1494_v29 = vmul.f32 %v1393_v10, %v2938_v11  ;;  %v2110_v28 = vpop.f32.mrb[36].mxu0  ;;  %v2118_v32 = vpop.f32.mrb[36].mxu1  ;;  %p2532_p4 = scmp.ne.s32.totalorder %s3558_s17, %s2531_s26  ;;  %s2535_s13 = sshll.u32 %s2623_s24, 4  ;;  %s2536_s13 = int_to_ptr.vmem [resolvable:$false] %s2535_s13 }
 0x4b5   : > { %1504 = vst [vmem:[%s3525_s1 + $0x18] sm:$0xff] %v1488_v2  ;;  %1512 = vst [vmem:[%s3525_s1 + $0x58] sm:$0xff] %v1496_v0  ;;  %v1491_v4 = vmul.f32 %v2110_v28, %v2924_v8  ;;  %v1499_v13 = vmul.f32 %v2118_v32, %v2963_v16  ;;  %v1374_v61 = vpop.f32.mrb[37].mxu0  ;;  %v1406_v3 = vpop.f32.mrb[37].mxu1  ;;  %s2537_s22 = scalar_lea.vmem %s2536_s13, 4096  ;;  %p2538_p13 = scmp.lt.s32.totalorder %s3558_s17, %s2536_s13 }
 0x4b6   : > { %1502 = vst [vmem:[%s3525_s1 + $0x8] sm:$0xff] %v1486_v22  ;;  %1510 = vst [vmem:[%s3525_s1 + $0x48] sm:$0xff] %v1494_v29  ;;  %v1489_v1 = vmul.f32 %v1374_v61, %v2908_v5  ;;  %v1497_v11 = vmul.f32 %v1406_v3, %v2957_v14  ;;  %v2111_v18 = vpop.f32.mrb[38].mxu0  ;;  %v2119_v54 = vpop.f32.mrb[38].mxu1  ;;  %p2533_p1 = pnand %p2532_p4, %p3651_p6  ;;  %p2539_p5 = scmp.lt.s32.totalorder %s2537_s22, %s2531_s26 }
 0x4b7   : > { %1507 = vst [vmem:[%s3525_s1 + $0x30] sm:$0xff] %v1491_v4  ;;  %1515 = vst [vmem:[%s3525_s1 + $0x70] sm:$0xff] %v1499_v13  ;;  %v1492_v8 = vmul.f32 %v2111_v18, %v2927_v9  ;;  %v1500_v16 = vmul.f32 %v2119_v54, %v2971_v17  ;;  %v1377_v60 = vpop.f32.mrb[39].mxu0  ;;  %v1409_v47 = vpop.f32.mrb[39].mxu1 }
 0x4b8   : > { %1505 = vst [vmem:[%s3525_s1 + $0x20] sm:$0xff] %v1489_v1  ;;  %1513 = vst [vmem:[%s3525_s1 + $0x60] sm:$0xff] %v1497_v11  ;;  %v1490_v5 = vmul.f32 %v1377_v60, %v2911_v6  ;;  %v1498_v14 = vmul.f32 %v1409_v47, %v2960_v15  ;;  %p2534_p0 = pneg %p2533_p1  ;;  %p2540_p9 = por %p2539_p5, %p2538_p13 }
 0x4b9   : > { %1508 = vst [vmem:[%s3525_s1 + $0x38] sm:$0xff] %v1492_v8  ;;  %1516 = vst [vmem:[%s3525_s1 + $0x78] sm:$0xff] %v1500_v16 }
 0x4ba   : > { %1506 = vst [vmem:[%s3525_s1 + $0x28] sm:$0xff] %v1490_v5  ;;  %1514 = vst [vmem:[%s3525_s1 + $0x68] sm:$0xff] %v1498_v14  ;;  %p2541_p12 = pnand %p2540_p9, %p2534_p0 }
 0x4bc   : > { %2544 = shalt.err (!%p2541_p12)
}
 0x4bd   : > { %s2545_s9 = scalar_lea.hbm %s3556_s20, 2048  ;;  %s2549_s21 = scalar_lea.hbm %s3619_s8, 4096 }
 0x4be   : > { %p2546_p3 = scmp.ne.s32.totalorder %s3556_s20, %s2545_s9  ;;  %p2550_p7 = scmp.lt.u32.totalorder %s3556_s20, %s3619_s8 }
 0x4bf   : > { %p2551_p11 = scmp.lt.u32.totalorder %s2549_s21, %s2545_s9  ;;  %p2553_p4 = scmp.lt.u32.totalorder %s2545_s9, %s3556_s20 }
 0x4c0   : > { %p2547_p8 = pnand %p2546_p3, %p3651_p6 }
 0x4c1   : > { %p2552_p2 = por %p2551_p11, %p2550_p7 }
 0x4c2   : > { %p2548_p10 = pneg %p2547_p8 }
 0x4c3   : > { %p2554_p1 = por %p2553_p4, %p2552_p2 }
 0x4c5   : > { %p2555_p0 = pnand %p2554_p1, %p2548_p10 }
 0x4c7   : > { %2558 = shalt.err (!%p2555_p0)
}
 0x4c8   : > { %2145 = dma.vmem_to_hbm [thread:$0]  (%p3651_p6), %s3558_s17, 2048, %s3556_s20, %s1533_s23, %s2619_s25, %s2619_s25, %s2620_s19  }
 0x4c9 PF: > { %s3652_s15 = sld [smem:[#allocation19_spill]]  ;;  %s3653_s1 = sld [smem:[#allocation23_spill]] }
 0x4ca   : > { %p3655_p5 = scmp.ge.s32.totalorder %s2609_s30, 2 }
 0x4cf   : > { %s1609_s29 = sand.u32 1, %s3652_s15   ;;  %p3654_p13 = scmp.ne.s32.totalorder %s3653_s1, 0 }
 0x4d0   : > { %s1610_s18 = scalar_lea.sflag [#allocation4], %s1609_s29 }
 0x4d1   : > { %p2161_p9 = pnand %p3655_p5, %p3654_p13 }
 0x4d3   : > { %2584 = dma.done.wait (!%p2161_p9), %s1610_s18, 2048  }
 0x4d4   : > { %2586 = vsyncadd (!%p2161_p9), %s1610_s18, 4294965248  ;;  %s3656_s16 = sadd.s32 4294967294, %s2609_s30  }
 0x4d5   : > { %s1618_s26 = sand.u32 1, %s3656_s16  }
 0x4d6   : > { %s1619_s24 = scalar_lea.sflag [#allocation10], %s1618_s26 }
 0x4d7   : > { %2588 = dma.done.wait (!%p2161_p9), %s1619_s24, 4096  }
 0x4d8   : > { %2590 = vsyncadd (!%p2161_p9), %s1619_s24, 4294963200  ;;  %s1637_s14 = scalar_lea.sflag [#allocation13], %s1609_s29 }
 0x4d9   : > { %2592 = dma.done.wait (!%p2161_p9), %s1637_s14, 2048  }
 0x4da   : > { %2594 = vsyncadd (!%p2161_p9), %s1637_s14, 4294965248  ;;  %s3657_s30 = sld [smem:[#allocation21_spill]]  ;;  %s3658_s25 = sld [smem:[#allocation20_spill]] }
 0x4db   : > { %s3659_s29 = sld [smem:[#allocation22_spill]]  ;;  %s3660_s27 = smov %s2601_s28 }
 0x4e0   : > { %p31_p6 = scmp.ge.s32.totalorder %s3657_s30, 4   ;;  %s3661_s28 = smov %s3658_s25 }
 0x4e2   :  { %33 = sbr.rel (!%p31_p6) target bundleno = 13 (0xd), region = 164 }
 0x4e9   :  { %1642 = vsyncpa [#allocation3], 1 }
 0x4ea   :  { %1644 = vsyncpa [#allocation3 + $0x1], 1 }
 0x4eb   :  { %1645 = vsyncpa [#allocation6], 1 }
 0x4ec   :  { %1647 = vsyncpa [#allocation6 + $0x1], 1 }
 0x4ed   :  { %1648 = vsyncpa [#allocation4], 1 }
 0x4ee   :  { %1650 = vsyncpa [#allocation4 + $0x1], 1 }
 0x4ef   :  { %1651 = vsyncpa [#allocation10], 1 }
 0x4f0   :  { %1653 = vsyncpa [#allocation10 + $0x1], 1 }
 0x4f1   :  { %1654 = vsyncpa [#allocation13], 1 }
 0x4f2   :  { %1656 = vsyncpa [#allocation13 + $0x1], 1 }

</bundles_post_ra>
